<compile_context>
chip_gen: v7x
topology: tpu7x:2x2x1
jax: 0.10.0
libtpu: 0.0.40
codegen_flags: <defaults>
</compile_context>

<pallas_src>
import functools

import jax
import jax.numpy as jnp
from jax.experimental import pallas as pl
from jax.experimental.pallas import tpu as pltpu

EXPANSION = 4
EPS = 1e-5
COMPUTE_DTYPE = jnp.bfloat16            # MXU-native input dtype
VMEM_LIMIT = 32 * 1024 * 1024           # safe on v5e/v6e/v7x


# ---------------------------------------------------------------------------
# Parameter folding
# ---------------------------------------------------------------------------
def _fold_bn(gamma, beta, mean, var, eps=EPS):
    """Inference BN -> per-channel (scale, shift). scale is folded into the conv
    weight columns; shift stays fp32 for the kernel epilogue."""
    scale = gamma / jnp.sqrt(var + eps)
    shift = beta - mean * scale
    return scale.astype(jnp.float32), shift[None, :].astype(jnp.float32)


# ---------------------------------------------------------------------------
# Fully fused bottleneck kernel (stride == 1), one grid step per batch image.
# ---------------------------------------------------------------------------
def _bottleneck_fused_kernel(x_ref, w1_ref, b1_ref, w2_ref, b2_ref,
                             w3_ref, b3_ref, *rest, H, W, planes, projection):
    if projection:
        wsc_ref, bsc_ref, o_ref, yp_ref = rest
    else:
        o_ref, yp_ref = rest

    HW = H * W
    x2d = x_ref[0]                                            # (H*W, Cin) bf16

    # conv1 (1x1) + bn1 (scale folded into w1) + relu
    y1 = jnp.dot(x2d, w1_ref[...], preferred_element_type=jnp.float32)
    y1 = jnp.maximum(y1 + b1_ref[...], 0.0)                   # (H*W, planes) f32

    # conv2 "padding=1": write y1 into a zero-padded VMEM scratch
    yp_ref[...] = jnp.zeros_like(yp_ref)
    yp_ref[1:H + 1, 1:W + 1, :] = y1.reshape(H, W, planes)

    # conv2 (3x3, stride 1) + bn2 + relu: accumulate the 9 taps, all in VMEM
    yp = yp_ref[...].astype(COMPUTE_DTYPE)                    # (H+2, W+2, planes)
    acc = jnp.zeros((HW, planes), jnp.float32)
    for kh in range(3):
        for kw in range(3):
            tap = yp[kh:kh + H, kw:kw + W, :].reshape(HW, planes)
            acc = acc + jnp.dot(tap, w2_ref[kh * 3 + kw],
                                preferred_element_type=jnp.float32)
    y2 = jnp.maximum(acc + b2_ref[...], 0.0).astype(COMPUTE_DTYPE)

    # conv3 (1x1) + bn3
    y3 = jnp.dot(y2, w3_ref[...], preferred_element_type=jnp.float32) + b3_ref[...]

    # shortcut: 1x1 projection (+bn) or identity; residual add + final relu
    if projection:
        res = jnp.dot(x2d, wsc_ref[...],
                      preferred_element_type=jnp.float32) + bsc_ref[...]
    else:
        res = x2d.astype(jnp.float32)
    o_ref[0] = jnp.maximum(y3 + res, 0.0)


def _bottleneck_fused(x_nhwc, p, planes):
    N, H, W, Cin = x_nhwc.shape
    Cout = EXPANSION * planes
    HW = H * W
    projection = "sc_w" in p

    x2d = x_nhwc.astype(COMPUTE_DTYPE).reshape(N, HW, Cin)

    s1, b1 = _fold_bn(p["bn1_g"], p["bn1_b"], p["bn1_m"], p["bn1_v"])
    w1 = (p["conv1_w"].reshape(planes, Cin).T * s1[None, :]).astype(COMPUTE_DTYPE)

    s2, b2 = _fold_bn(p["bn2_g"], p["bn2_b"], p["bn2_m"], p["bn2_v"])
    w2 = (jnp.transpose(p["conv2_w"], (2, 3, 1, 0)).reshape(9, planes, planes)
          * s2[None, None, :]).astype(COMPUTE_DTYPE)

    s3, b3 = _fold_bn(p["bn3_g"], p["bn3_b"], p["bn3_m"], p["bn3_v"])
    w3 = (p["conv3_w"].reshape(Cout, planes).T * s3[None, :]).astype(COMPUTE_DTYPE)

    args = [x2d, w1, b1, w2, b2, w3, b3]
    in_specs = [
        pl.BlockSpec((1, HW, Cin), lambda n: (n, 0, 0)),
        pl.BlockSpec((Cin, planes), lambda n: (0, 0)),
        pl.BlockSpec((1, planes), lambda n: (0, 0)),
        pl.BlockSpec((9, planes, planes), lambda n: (0, 0, 0)),
        pl.BlockSpec((1, planes), lambda n: (0, 0)),
        pl.BlockSpec((planes, Cout), lambda n: (0, 0)),
        pl.BlockSpec((1, Cout), lambda n: (0, 0)),
    ]
    flops = 2 * N * HW * (Cin * planes + 9 * planes * planes + planes * Cout)
    if projection:
        ssc, bsc = _fold_bn(p["sc_g"], p["sc_b"], p["sc_m"], p["sc_v"])
        wsc = (p["sc_w"].reshape(Cout, Cin).T * ssc[None, :]).astype(COMPUTE_DTYPE)
        args += [wsc, bsc]
        in_specs += [pl.BlockSpec((Cin, Cout), lambda n: (0, 0)),
                     pl.BlockSpec((1, Cout), lambda n: (0, 0))]
        flops += 2 * N * HW * Cin * Cout

    bytes_accessed = int(sum(a.size * a.dtype.itemsize for a in args)
                         + N * HW * Cout * 4)
    kernel = functools.partial(_bottleneck_fused_kernel, H=H, W=W,
                               planes=planes, projection=projection)
    out = pl.pallas_call(
        kernel,
        out_shape=jax.ShapeDtypeStruct((N, HW, Cout), jnp.float32),
        grid=(N,),
        in_specs=in_specs,
        out_specs=pl.BlockSpec((1, HW, Cout), lambda n: (n, 0, 0)),
        scratch_shapes=[pltpu.VMEM((H + 2, W + 2, planes), jnp.float32)],
        compiler_params=pltpu.CompilerParams(
            dimension_semantics=("parallel",),
            vmem_limit_bytes=VMEM_LIMIT),
        cost_estimate=pl.CostEstimate(flops=int(flops), transcendentals=0,
                                      bytes_accessed=bytes_accessed),
    )(*args)
    return out.reshape(N, H, W, Cout)


# ---------------------------------------------------------------------------
# Fallback path for stride != 1: row-tiled bf16 matmul kernels + wrapper im2col
# ---------------------------------------------------------------------------
def _mm_kernel(x_ref, w_ref, b_ref, o_ref, *, relu):
    y = jnp.dot(x_ref[...], w_ref[...], preferred_element_type=jnp.float32)
    y = y + b_ref[...]
    if relu:
        y = jnp.maximum(y, 0.0)
    o_ref[...] = y


def _mm_res_kernel(x_ref, w_ref, b_ref, res_ref, o_ref):
    y = (jnp.dot(x_ref[...], w_ref[...], preferred_element_type=jnp.float32)
         + b_ref[...] + res_ref[...])
    o_ref[...] = jnp.maximum(y, 0.0)


def _row_tile(m):
    return min(512, ((m + 7) // 8) * 8)


def _matmul_bias(x, w, b, *, relu=False, res=None):
    """out = [relu]( x @ w + b [+ res] );  x:(M,K) bf16, w:(K,N) bf16, b:(1,N) f32."""
    M, K = x.shape
    Nc = w.shape[1]
    TM = _row_tile(M)
    in_specs = [pl.BlockSpec((TM, K), lambda i: (i, 0)),
                pl.BlockSpec((K, Nc), lambda i: (0, 0)),
                pl.BlockSpec((1, Nc), lambda i: (0, 0))]
    args = [x, w, b]
    if res is None:
        kernel = functools.partial(_mm_kernel, relu=relu)
    else:
        kernel = _mm_res_kernel
        in_specs.append(pl.BlockSpec((TM, Nc), lambda i: (i, 0)))
        args.append(res)
    return pl.pallas_call(
        kernel,
        out_shape=jax.ShapeDtypeStruct((M, Nc), jnp.float32),
        grid=(pl.cdiv(M, TM),),
        in_specs=in_specs,
        out_specs=pl.BlockSpec((TM, Nc), lambda i: (i, 0)),
        compiler_params=pltpu.CompilerParams(
            dimension_semantics=("parallel",),
            vmem_limit_bytes=VMEM_LIMIT),
        cost_estimate=pl.CostEstimate(
            flops=2 * M * K * Nc, transcendentals=0,
            bytes_accessed=int(x.size * 2 + w.size * 2 + M * Nc * 4)),
    )(*args)


def _im2col_3x3(x_nhwc, stride):
    """3x3, padding=1 patches -> (N*Ho*Wo, 9*C) in (kh, kw, c) order."""
    N, H, W, C = x_nhwc.shape
    xp = jnp.pad(x_nhwc, ((0, 0), (1, 1), (1, 1), (0, 0)))
    Ho = (H + 2 - 3) // stride + 1
    Wo = (W + 2 - 3) // stride + 1
    cols = []
    for kh in range(3):
        for kw in range(3):
            cols.append(xp[:, kh:kh + (Ho - 1) * stride + 1:stride,
                           kw:kw + (Wo - 1) * stride + 1:stride, :])
    patches = jnp.concatenate(cols, axis=-1)
    return patches.reshape(N * Ho * Wo, 9 * C), Ho, Wo


def _bottleneck_strided(x_nhwc, p, planes, stride):
    # stride != 1 always uses the projection shortcut (module condition).
    N, H, W, Cin = x_nhwc.shape
    Cout = EXPANSION * planes

    s1, b1 = _fold_bn(p["bn1_g"], p["bn1_b"], p["bn1_m"], p["bn1_v"])
    w1 = (p["conv1_w"].reshape(planes, Cin).T * s1[None, :]).astype(COMPUTE_DTYPE)
    y1 = _matmul_bias(x_nhwc.reshape(N * H * W, Cin).astype(COMPUTE_DTYPE),
                      w1, b1, relu=True)

    patches, Ho, Wo = _im2col_3x3(y1.reshape(N, H, W, planes), stride)
    s2, b2 = _fold_bn(p["bn2_g"], p["bn2_b"], p["bn2_m"], p["bn2_v"])
    w2 = (jnp.transpose(p["conv2_w"], (2, 3, 1, 0)).reshape(9 * planes, planes)
          * s2[None, :]).astype(COMPUTE_DTYPE)
    y2 = _matmul_bias(patches.astype(COMPUTE_DTYPE), w2, b2, relu=True)

    xs = x_nhwc[:, ::stride, ::stride, :].reshape(N * Ho * Wo, Cin)
    ssc, bsc = _fold_bn(p["sc_g"], p["sc_b"], p["sc_m"], p["sc_v"])
    wsc = (p["sc_w"].reshape(Cout, Cin).T * ssc[None, :]).astype(COMPUTE_DTYPE)
    res = _matmul_bias(xs.astype(COMPUTE_DTYPE), wsc, bsc, relu=False)

    s3, b3 = _fold_bn(p["bn3_g"], p["bn3_b"], p["bn3_m"], p["bn3_v"])
    w3 = (p["conv3_w"].reshape(Cout, planes).T * s3[None, :]).astype(COMPUTE_DTYPE)
    out = _matmul_bias(y2.astype(COMPUTE_DTYPE), w3, b3, res=res)
    return out.reshape(N, Ho, Wo, Cout)


# ---------------------------------------------------------------------------
# Public entry point
# ---------------------------------------------------------------------------
def bottleneck_pallas(x_nchw, params, stride=1):
    planes = params["conv1_w"].shape[0]
    x_nhwc = jnp.transpose(x_nchw, (0, 2, 3, 1)).astype(jnp.float32)
    if stride == 1:
        out = _bottleneck_fused(x_nhwc, params, planes)
    else:
        out = _bottleneck_strided(x_nhwc, params, planes, stride)
    return jnp.transpose(out, (0, 3, 1, 2))  # back to NCHW


# ---------------------------------------------------------------------------
# Pure-JAX reference (mirrors the PyTorch forward, inference-mode BN)
# ---------------------------------------------------------------------------
def bottleneck_reference(x, p, stride):
    def conv(x, w, s=1, pad=0):
        return jax.lax.conv_general_dilated(
            x, w, (s, s), [(pad, pad), (pad, pad)],
            dimension_numbers=("NCHW", "OIHW", "NCHW"))

    def bn(x, g, b, m, v):
        g, b, m, v = (a[None, :, None, None] for a in (g, b, m, v))
        return g * (x - m) / jnp.sqrt(v + EPS) + b

    planes = p["conv1_w"].shape[0]
    Cout = EXPANSION * planes
    out = jax.nn.relu(bn(conv(x, p["conv1_w"]),
                         p["bn1_g"], p["bn1_b"], p["bn1_m"], p["bn1_v"]))
    out = jax.nn.relu(bn(conv(out, p["conv2_w"], s=stride, pad=1),
                         p["bn2_g"], p["bn2_b"], p["bn2_m"], p["bn2_v"]))
    out = bn(conv(out, p["conv3_w"]), p["bn3_g"], p["bn3_b"], p["bn3_m"], p["bn3_v"])
    if stride != 1 or x.shape[1] != Cout:
        sc = bn(conv(x, p["sc_w"], s=stride),
                p["sc_g"], p["sc_b"], p["sc_m"], p["sc_v"])
    else:
        sc = x
    return jax.nn.relu(out + sc)


# ---------------------------------------------------------------------------
# Deterministic parameter init (shapes match the nn.Module)
# ---------------------------------------------------------------------------
def init_params(key, in_planes, planes, stride):
    Cout = EXPANSION * planes
    keys = jax.random.split(key, 24)
    ki = iter(keys)

    def w(shape, scale=0.1):
        return jax.random.normal(next(ki), shape, jnp.float32) * scale

    def bn_params(c):
        return (
            1.0 + 0.1 * jax.random.normal(next(ki), (c,), jnp.float32),   # gamma
            0.1 * jax.random.normal(next(ki), (c,), jnp.float32),         # beta
            0.1 * jax.random.normal(next(ki), (c,), jnp.float32),         # running_mean
            0.5 + jax.random.uniform(next(ki), (c,), jnp.float32),        # running_var
        )

    p = {}
    p["conv1_w"] = w((planes, in_planes, 1, 1))
    p["bn1_g"], p["bn1_b"], p["bn1_m"], p["bn1_v"] = bn_params(planes)
    p["conv2_w"] = w((planes, planes, 3, 3))
    p["bn2_g"], p["bn2_b"], p["bn2_m"], p["bn2_v"] = bn_params(planes)
    p["conv3_w"] = w((Cout, planes, 1, 1))
    p["bn3_g"], p["bn3_b"], p["bn3_m"], p["bn3_v"] = bn_params(Cout)
    if stride != 1 or in_planes != Cout:
        p["sc_w"] = w((Cout, in_planes, 1, 1))
        p["sc_g"], p["sc_b"], p["sc_m"], p["sc_v"] = bn_params(Cout)
    return p


if __name__ == "__main__":
    key = jax.random.PRNGKey(0)

    configs = [
        # (N, in_planes, planes, H, W, stride)
        (2, 4, 4, 16, 16, 1),     # projection shortcut, fused path
        (2, 16, 4, 16, 16, 1),    # identity shortcut, fused path
        (2, 4, 4, 16, 16, 2),     # strided projection shortcut, fallback path
    ]
    for idx, (N, in_planes, planes, H, W, stride) in enumerate(configs):
        k_x, k_p = jax.random.split(jax.random.fold_in(key, idx))
        x = jax.random.normal(k_x, (N, in_planes, H, W), jnp.float32)
        params = init_params(k_p, in_planes, planes, stride)

        out = jax.block_until_ready(bottleneck_pallas(x, params, stride))
        ref = bottleneck_reference(x, params, stride)
        if not jnp.allclose(out, ref, rtol=5e-2, atol=2e-2):
            err = float(jnp.max(jnp.abs(out - ref)))
            raise AssertionError(
                f"config {idx}: Pallas Bottleneck mismatch (max abs err {err})")

    print("KERNEL_OK")
</pallas_src>

<mosaic_0001>
module attributes {stable_mosaic.version = 11 : i64} {
  func.func @_bottleneck_fused_kernel(%arg0: i32, %arg1: memref<1x256x4xbf16, #tpu.memory_space<vmem>>, %arg2: memref<4x4xbf16, #tpu.memory_space<vmem>>, %arg3: memref<1x4xf32, #tpu.memory_space<vmem>>, %arg4: memref<9x4x4xbf16, #tpu.memory_space<vmem>>, %arg5: memref<1x4xf32, #tpu.memory_space<vmem>>, %arg6: memref<4x16xbf16, #tpu.memory_space<vmem>>, %arg7: memref<1x16xf32, #tpu.memory_space<vmem>>, %arg8: memref<4x16xbf16, #tpu.memory_space<vmem>>, %arg9: memref<1x16xf32, #tpu.memory_space<vmem>>, %arg10: memref<1x256x16xf32, #tpu.memory_space<vmem>>, %arg11: memref<18x18x4xf32, #tpu.memory_space<vmem>>) attributes {dimension_semantics = [#tpu.dimension_semantics<parallel>], iteration_bounds = array<i64: 2>, scalar_prefetch = 0 : i64, scratch_operands = 1 : i64, tpu.core_type = #tpu.core_type<tc>, window_params = [{transform_indices = @transform_0, window_bounds = array<i64: 1, 256, 4>}, {pipeline_mode = #tpu.pipeline_mode<synchronous>, transform_indices = @transform_1, window_bounds = array<i64: 4, 4>}, {pipeline_mode = #tpu.pipeline_mode<synchronous>, transform_indices = @transform_2, window_bounds = array<i64: 1, 4>}, {pipeline_mode = #tpu.pipeline_mode<synchronous>, transform_indices = @transform_3, window_bounds = array<i64: 9, 4, 4>}, {pipeline_mode = #tpu.pipeline_mode<synchronous>, transform_indices = @transform_4, window_bounds = array<i64: 1, 4>}, {pipeline_mode = #tpu.pipeline_mode<synchronous>, transform_indices = @transform_5, window_bounds = array<i64: 4, 16>}, {pipeline_mode = #tpu.pipeline_mode<synchronous>, transform_indices = @transform_6, window_bounds = array<i64: 1, 16>}, {pipeline_mode = #tpu.pipeline_mode<synchronous>, transform_indices = @transform_7, window_bounds = array<i64: 4, 16>}, {pipeline_mode = #tpu.pipeline_mode<synchronous>, transform_indices = @transform_8, window_bounds = array<i64: 1, 16>}, {transform_indices = @transform_9, window_bounds = array<i64: 1, 256, 16>}]} {
    %c0 = arith.constant 0 : index
    %c0_0 = arith.constant 0 : index
    %c0_1 = arith.constant 0 : index
    %0 = vector.load %arg1[%c0, %c0_0, %c0_1] : memref<1x256x4xbf16, #tpu.memory_space<vmem>>, vector<1x256x4xbf16>
    %1 = vector.shape_cast %0 : vector<1x256x4xbf16> to vector<256x4xbf16>
    %c0_2 = arith.constant 0 : index
    %c0_3 = arith.constant 0 : index
    %2 = vector.load %arg2[%c0_2, %c0_3] : memref<4x4xbf16, #tpu.memory_space<vmem>>, vector<4x4xbf16>
    %cst = arith.constant dense<0.000000e+00> : vector<256x4xf32>
    %3 = tpu.matmul %1, %2, %cst {dimension_numbers = #tpu.dot_dimension_numbers<[1], [0], [0], [1], [0, 0, 1, 1], [], []>} : vector<256x4xbf16>, vector<4x4xbf16>, vector<256x4xf32> -> vector<256x4xf32>
    %c0_4 = arith.constant 0 : index
    %c0_5 = arith.constant 0 : index
    %4 = vector.load %arg3[%c0_4, %c0_5] : memref<1x4xf32, #tpu.memory_space<vmem>>, vector<1x4xf32>
    %5 = vector.broadcast %4 : vector<1x4xf32> to vector<256x4xf32>
    %6 = arith.addf %3, %5 : vector<256x4xf32>
    %cst_6 = arith.constant 0.000000e+00 : f32
    %7 = vector.broadcast %cst_6 : f32 to vector<256x4xf32>
    %8 = arith.maximumf %6, %7 : vector<256x4xf32>
    %cst_7 = arith.constant 0.000000e+00 : f32
    %9 = vector.broadcast %cst_7 : f32 to vector<18x18x4xf32>
    %c0_8 = arith.constant 0 : index
    %c0_9 = arith.constant 0 : index
    %c0_10 = arith.constant 0 : index
    %10 = vector.load %arg11[%c0_8, %c0_9, %c0_10] : memref<18x18x4xf32, #tpu.memory_space<vmem>>, vector<18x18x4xf32>
    tpu.vector_store %arg11[%c0_8, %c0_9, %c0_10], %9 {strides = array<i32>} : memref<18x18x4xf32, #tpu.memory_space<vmem>>, vector<18x18x4xf32>,
    %11 = vector.shape_cast %8 : vector<256x4xf32> to vector<16x16x4xf32>
    %c1 = arith.constant 1 : index
    %c1_11 = arith.constant 1 : index
    %c0_12 = arith.constant 0 : index
    %12 = vector.load %arg11[%c1, %c1_11, %c0_12] : memref<18x18x4xf32, #tpu.memory_space<vmem>>, vector<16x16x4xf32>
    tpu.vector_store %arg11[%c1, %c1_11, %c0_12], %11 {strides = array<i32>} : memref<18x18x4xf32, #tpu.memory_space<vmem>>, vector<16x16x4xf32>,
    %c0_13 = arith.constant 0 : index
    %c0_14 = arith.constant 0 : index
    %c0_15 = arith.constant 0 : index
    %13 = vector.load %arg11[%c0_13, %c0_14, %c0_15] : memref<18x18x4xf32, #tpu.memory_space<vmem>>, vector<18x18x4xf32>
    %14 = arith.truncf %13 : vector<18x18x4xf32> to vector<18x18x4xbf16>
    %cst_16 = arith.constant 0.000000e+00 : f32
    %15 = vector.broadcast %cst_16 : f32 to vector<256x4xf32>
    %16 = vector.extract_strided_slice %14 {offsets = [0, 0, 0], sizes = [16, 16, 4], strides = [1, 1, 1]} : vector<18x18x4xbf16> to vector<16x16x4xbf16>
    %17 = vector.shape_cast %16 : vector<16x16x4xbf16> to vector<256x4xbf16>
    %c0_17 = arith.constant 0 : index
    %c0_18 = arith.constant 0 : index
    %c0_19 = arith.constant 0 : index
    %18 = vector.load %arg4[%c0_17, %c0_18, %c0_19] : memref<9x4x4xbf16, #tpu.memory_space<vmem>>, vector<1x4x4xbf16>
    %19 = vector.shape_cast %18 : vector<1x4x4xbf16> to vector<4x4xbf16>
    %cst_20 = arith.constant dense<0.000000e+00> : vector<256x4xf32>
    %20 = tpu.matmul %17, %19, %cst_20 {dimension_numbers = #tpu.dot_dimension_numbers<[1], [0], [0], [1], [0, 0, 1, 1], [], []>} : vector<256x4xbf16>, vector<4x4xbf16>, vector<256x4xf32> -> vector<256x4xf32>
    %21 = arith.addf %15, %20 : vector<256x4xf32>
    %22 = vector.extract_strided_slice %14 {offsets = [0, 1, 0], sizes = [16, 16, 4], strides = [1, 1, 1]} : vector<18x18x4xbf16> to vector<16x16x4xbf16>
    %23 = vector.shape_cast %22 : vector<16x16x4xbf16> to vector<256x4xbf16>
    %c1_21 = arith.constant 1 : index
    %c0_22 = arith.constant 0 : index
    %c0_23 = arith.constant 0 : index
    %24 = vector.load %arg4[%c1_21, %c0_22, %c0_23] : memref<9x4x4xbf16, #tpu.memory_space<vmem>>, vector<1x4x4xbf16>
    %25 = vector.shape_cast %24 : vector<1x4x4xbf16> to vector<4x4xbf16>
    %cst_24 = arith.constant dense<0.000000e+00> : vector<256x4xf32>
    %26 = tpu.matmul %23, %25, %cst_24 {dimension_numbers = #tpu.dot_dimension_numbers<[1], [0], [0], [1], [0, 0, 1, 1], [], []>} : vector<256x4xbf16>, vector<4x4xbf16>, vector<256x4xf32> -> vector<256x4xf32>
    %27 = arith.addf %21, %26 : vector<256x4xf32>
    %28 = vector.extract_strided_slice %14 {offsets = [0, 2, 0], sizes = [16, 16, 4], strides = [1, 1, 1]} : vector<18x18x4xbf16> to vector<16x16x4xbf16>
    %29 = vector.shape_cast %28 : vector<16x16x4xbf16> to vector<256x4xbf16>
    %c2 = arith.constant 2 : index
    %c0_25 = arith.constant 0 : index
    %c0_26 = arith.constant 0 : index
    %30 = vector.load %arg4[%c2, %c0_25, %c0_26] : memref<9x4x4xbf16, #tpu.memory_space<vmem>>, vector<1x4x4xbf16>
    %31 = vector.shape_cast %30 : vector<1x4x4xbf16> to vector<4x4xbf16>
    %cst_27 = arith.constant dense<0.000000e+00> : vector<256x4xf32>
    %32 = tpu.matmul %29, %31, %cst_27 {dimension_numbers = #tpu.dot_dimension_numbers<[1], [0], [0], [1], [0, 0, 1, 1], [], []>} : vector<256x4xbf16>, vector<4x4xbf16>, vector<256x4xf32> -> vector<256x4xf32>
    %33 = arith.addf %27, %32 : vector<256x4xf32>
    %34 = vector.extract_strided_slice %14 {offsets = [1, 0, 0], sizes = [16, 16, 4], strides = [1, 1, 1]} : vector<18x18x4xbf16> to vector<16x16x4xbf16>
    %35 = vector.shape_cast %34 : vector<16x16x4xbf16> to vector<256x4xbf16>
    %c3 = arith.constant 3 : index
    %c0_28 = arith.constant 0 : index
    %c0_29 = arith.constant 0 : index
    %36 = vector.load %arg4[%c3, %c0_28, %c0_29] : memref<9x4x4xbf16, #tpu.memory_space<vmem>>, vector<1x4x4xbf16>
    %37 = vector.shape_cast %36 : vector<1x4x4xbf16> to vector<4x4xbf16>
    %cst_30 = arith.constant dense<0.000000e+00> : vector<256x4xf32>
    %38 = tpu.matmul %35, %37, %cst_30 {dimension_numbers = #tpu.dot_dimension_numbers<[1], [0], [0], [1], [0, 0, 1, 1], [], []>} : vector<256x4xbf16>, vector<4x4xbf16>, vector<256x4xf32> -> vector<256x4xf32>
    %39 = arith.addf %33, %38 : vector<256x4xf32>
    %40 = vector.extract_strided_slice %14 {offsets = [1, 1, 0], sizes = [16, 16, 4], strides = [1, 1, 1]} : vector<18x18x4xbf16> to vector<16x16x4xbf16>
    %41 = vector.shape_cast %40 : vector<16x16x4xbf16> to vector<256x4xbf16>
    %c4 = arith.constant 4 : index
    %c0_31 = arith.constant 0 : index
    %c0_32 = arith.constant 0 : index
    %42 = vector.load %arg4[%c4, %c0_31, %c0_32] : memref<9x4x4xbf16, #tpu.memory_space<vmem>>, vector<1x4x4xbf16>
    %43 = vector.shape_cast %42 : vector<1x4x4xbf16> to vector<4x4xbf16>
    %cst_33 = arith.constant dense<0.000000e+00> : vector<256x4xf32>
    %44 = tpu.matmul %41, %43, %cst_33 {dimension_numbers = #tpu.dot_dimension_numbers<[1], [0], [0], [1], [0, 0, 1, 1], [], []>} : vector<256x4xbf16>, vector<4x4xbf16>, vector<256x4xf32> -> vector<256x4xf32>
    %45 = arith.addf %39, %44 : vector<256x4xf32>
    %46 = vector.extract_strided_slice %14 {offsets = [1, 2, 0], sizes = [16, 16, 4], strides = [1, 1, 1]} : vector<18x18x4xbf16> to vector<16x16x4xbf16>
    %47 = vector.shape_cast %46 : vector<16x16x4xbf16> to vector<256x4xbf16>
    %c5 = arith.constant 5 : index
    %c0_34 = arith.constant 0 : index
    %c0_35 = arith.constant 0 : index
    %48 = vector.load %arg4[%c5, %c0_34, %c0_35] : memref<9x4x4xbf16, #tpu.memory_space<vmem>>, vector<1x4x4xbf16>
    %49 = vector.shape_cast %48 : vector<1x4x4xbf16> to vector<4x4xbf16>
    %cst_36 = arith.constant dense<0.000000e+00> : vector<256x4xf32>
    %50 = tpu.matmul %47, %49, %cst_36 {dimension_numbers = #tpu.dot_dimension_numbers<[1], [0], [0], [1], [0, 0, 1, 1], [], []>} : vector<256x4xbf16>, vector<4x4xbf16>, vector<256x4xf32> -> vector<256x4xf32>
    %51 = arith.addf %45, %50 : vector<256x4xf32>
    %52 = vector.extract_strided_slice %14 {offsets = [2, 0, 0], sizes = [16, 16, 4], strides = [1, 1, 1]} : vector<18x18x4xbf16> to vector<16x16x4xbf16>
    %53 = vector.shape_cast %52 : vector<16x16x4xbf16> to vector<256x4xbf16>
    %c6 = arith.constant 6 : index
    %c0_37 = arith.constant 0 : index
    %c0_38 = arith.constant 0 : index
    %54 = vector.load %arg4[%c6, %c0_37, %c0_38] : memref<9x4x4xbf16, #tpu.memory_space<vmem>>, vector<1x4x4xbf16>
    %55 = vector.shape_cast %54 : vector<1x4x4xbf16> to vector<4x4xbf16>
    %cst_39 = arith.constant dense<0.000000e+00> : vector<256x4xf32>
    %56 = tpu.matmul %53, %55, %cst_39 {dimension_numbers = #tpu.dot_dimension_numbers<[1], [0], [0], [1], [0, 0, 1, 1], [], []>} : vector<256x4xbf16>, vector<4x4xbf16>, vector<256x4xf32> -> vector<256x4xf32>
    %57 = arith.addf %51, %56 : vector<256x4xf32>
    %58 = vector.extract_strided_slice %14 {offsets = [2, 1, 0], sizes = [16, 16, 4], strides = [1, 1, 1]} : vector<18x18x4xbf16> to vector<16x16x4xbf16>
    %59 = vector.shape_cast %58 : vector<16x16x4xbf16> to vector<256x4xbf16>
    %c7 = arith.constant 7 : index
    %c0_40 = arith.constant 0 : index
    %c0_41 = arith.constant 0 : index
    %60 = vector.load %arg4[%c7, %c0_40, %c0_41] : memref<9x4x4xbf16, #tpu.memory_space<vmem>>, vector<1x4x4xbf16>
    %61 = vector.shape_cast %60 : vector<1x4x4xbf16> to vector<4x4xbf16>
    %cst_42 = arith.constant dense<0.000000e+00> : vector<256x4xf32>
    %62 = tpu.matmul %59, %61, %cst_42 {dimension_numbers = #tpu.dot_dimension_numbers<[1], [0], [0], [1], [0, 0, 1, 1], [], []>} : vector<256x4xbf16>, vector<4x4xbf16>, vector<256x4xf32> -> vector<256x4xf32>
    %63 = arith.addf %57, %62 : vector<256x4xf32>
    %64 = vector.extract_strided_slice %14 {offsets = [2, 2, 0], sizes = [16, 16, 4], strides = [1, 1, 1]} : vector<18x18x4xbf16> to vector<16x16x4xbf16>
    %65 = vector.shape_cast %64 : vector<16x16x4xbf16> to vector<256x4xbf16>
    %c8 = arith.constant 8 : index
    %c0_43 = arith.constant 0 : index
    %c0_44 = arith.constant 0 : index
    %66 = vector.load %arg4[%c8, %c0_43, %c0_44] : memref<9x4x4xbf16, #tpu.memory_space<vmem>>, vector<1x4x4xbf16>
    %67 = vector.shape_cast %66 : vector<1x4x4xbf16> to vector<4x4xbf16>
    %cst_45 = arith.constant dense<0.000000e+00> : vector<256x4xf32>
    %68 = tpu.matmul %65, %67, %cst_45 {dimension_numbers = #tpu.dot_dimension_numbers<[1], [0], [0], [1], [0, 0, 1, 1], [], []>} : vector<256x4xbf16>, vector<4x4xbf16>, vector<256x4xf32> -> vector<256x4xf32>
    %69 = arith.addf %63, %68 : vector<256x4xf32>
    %c0_46 = arith.constant 0 : index
    %c0_47 = arith.constant 0 : index
    %70 = vector.load %arg5[%c0_46, %c0_47] : memref<1x4xf32, #tpu.memory_space<vmem>>, vector<1x4xf32>
    %71 = vector.broadcast %70 : vector<1x4xf32> to vector<256x4xf32>
    %72 = arith.addf %69, %71 : vector<256x4xf32>
    %cst_48 = arith.constant 0.000000e+00 : f32
    %73 = vector.broadcast %cst_48 : f32 to vector<256x4xf32>
    %74 = arith.maximumf %72, %73 : vector<256x4xf32>
    %75 = arith.truncf %74 : vector<256x4xf32> to vector<256x4xbf16>
    %c0_49 = arith.constant 0 : index
    %c0_50 = arith.constant 0 : index
    %76 = vector.load %arg6[%c0_49, %c0_50] : memref<4x16xbf16, #tpu.memory_space<vmem>>, vector<4x16xbf16>
    %cst_51 = arith.constant dense<0.000000e+00> : vector<256x16xf32>
    %77 = tpu.matmul %75, %76, %cst_51 {dimension_numbers = #tpu.dot_dimension_numbers<[1], [0], [0], [1], [0, 0, 1, 1], [], []>} : vector<256x4xbf16>, vector<4x16xbf16>, vector<256x16xf32> -> vector<256x16xf32>
    %c0_52 = arith.constant 0 : index
    %c0_53 = arith.constant 0 : index
    %78 = vector.load %arg7[%c0_52, %c0_53] : memref<1x16xf32, #tpu.memory_space<vmem>>, vector<1x16xf32>
    %79 = vector.broadcast %78 : vector<1x16xf32> to vector<256x16xf32>
    %80 = arith.addf %77, %79 : vector<256x16xf32>
    %c0_54 = arith.constant 0 : index
    %c0_55 = arith.constant 0 : index
    %81 = vector.load %arg8[%c0_54, %c0_55] : memref<4x16xbf16, #tpu.memory_space<vmem>>, vector<4x16xbf16>
    %cst_56 = arith.constant dense<0.000000e+00> : vector<256x16xf32>
    %82 = tpu.matmul %1, %81, %cst_56 {dimension_numbers = #tpu.dot_dimension_numbers<[1], [0], [0], [1], [0, 0, 1, 1], [], []>} : vector<256x4xbf16>, vector<4x16xbf16>, vector<256x16xf32> -> vector<256x16xf32>
    %c0_57 = arith.constant 0 : index
    %c0_58 = arith.constant 0 : index
    %83 = vector.load %arg9[%c0_57, %c0_58] : memref<1x16xf32, #tpu.memory_space<vmem>>, vector<1x16xf32>
    %84 = vector.broadcast %83 : vector<1x16xf32> to vector<256x16xf32>
    %85 = arith.addf %82, %84 : vector<256x16xf32>
    %86 = arith.addf %80, %85 : vector<256x16xf32>
    %cst_59 = arith.constant 0.000000e+00 : f32
    %87 = vector.broadcast %cst_59 : f32 to vector<256x16xf32>
    %88 = arith.maximumf %86, %87 : vector<256x16xf32>
    %c0_60 = arith.constant 0 : index
    %c0_61 = arith.constant 0 : index
    %c0_62 = arith.constant 0 : index
    %89 = vector.load %arg10[%c0_60, %c0_61, %c0_62] : memref<1x256x16xf32, #tpu.memory_space<vmem>>, vector<1x256x16xf32>
    %90 = vector.shape_cast %89 : vector<1x256x16xf32> to vector<256x16xf32>
    %91 = vector.shape_cast %88 : vector<256x16xf32> to vector<1x256x16xf32>
    tpu.vector_store %arg10[%c0_60, %c0_61, %c0_62], %91 {strides = array<i32>} : memref<1x256x16xf32, #tpu.memory_space<vmem>>, vector<1x256x16xf32>,
    return
  }
  func.func @transform_0(%arg0: i32) -> (i32, i32, i32) {
    %c0_i32 = arith.constant 0 : i32
    %c0_i32_0 = arith.constant 0 : i32
    %c0_i32_1 = arith.constant 0 : i32
    return %arg0, %c0_i32, %c0_i32_0 : i32, i32, i32
  }
  func.func @transform_1(%arg0: i32) -> (i32, i32) {
    %c0_i32 = arith.constant 0 : i32
    %c0_i32_0 = arith.constant 0 : i32
    %c0_i32_1 = arith.constant 0 : i32
    return %c0_i32, %c0_i32_0 : i32, i32
  }
  func.func @transform_2(%arg0: i32) -> (i32, i32) {
    %c0_i32 = arith.constant 0 : i32
    %c0_i32_0 = arith.constant 0 : i32
    %c0_i32_1 = arith.constant 0 : i32
    return %c0_i32, %c0_i32_0 : i32, i32
  }
  func.func @transform_3(%arg0: i32) -> (i32, i32, i32) {
    %c0_i32 = arith.constant 0 : i32
    %c0_i32_0 = arith.constant 0 : i32
    %c0_i32_1 = arith.constant 0 : i32
    %c0_i32_2 = arith.constant 0 : i32
    return %c0_i32, %c0_i32_0, %c0_i32_1 : i32, i32, i32
  }
  func.func @transform_4(%arg0: i32) -> (i32, i32) {
    %c0_i32 = arith.constant 0 : i32
    %c0_i32_0 = arith.constant 0 : i32
    %c0_i32_1 = arith.constant 0 : i32
    return %c0_i32, %c0_i32_0 : i32, i32
  }
  func.func @transform_5(%arg0: i32) -> (i32, i32) {
    %c0_i32 = arith.constant 0 : i32
    %c0_i32_0 = arith.constant 0 : i32
    %c0_i32_1 = arith.constant 0 : i32
    return %c0_i32, %c0_i32_0 : i32, i32
  }
  func.func @transform_6(%arg0: i32) -> (i32, i32) {
    %c0_i32 = arith.constant 0 : i32
    %c0_i32_0 = arith.constant 0 : i32
    %c0_i32_1 = arith.constant 0 : i32
    return %c0_i32, %c0_i32_0 : i32, i32
  }
  func.func @transform_7(%arg0: i32) -> (i32, i32) {
    %c0_i32 = arith.constant 0 : i32
    %c0_i32_0 = arith.constant 0 : i32
    %c0_i32_1 = arith.constant 0 : i32
    return %c0_i32, %c0_i32_0 : i32, i32
  }
  func.func @transform_8(%arg0: i32) -> (i32, i32) {
    %c0_i32 = arith.constant 0 : i32
    %c0_i32_0 = arith.constant 0 : i32
    %c0_i32_1 = arith.constant 0 : i32
    return %c0_i32, %c0_i32_0 : i32, i32
  }
  func.func @transform_9(%arg0: i32) -> (i32, i32, i32) {
    %c0_i32 = arith.constant 0 : i32
    %c0_i32_0 = arith.constant 0 : i32
    %c0_i32_1 = arith.constant 0 : i32
    return %arg0, %c0_i32, %c0_i32_0 : i32, i32, i32
  }
}

</mosaic_0001>

<bundles_post_ra>
// kernel: tpu_custom_call.1
= control target key start
LH: loop header
LB: loop body
LE: loop exit
PB: predicated region body
PF: predicated region fallthrough
CT: control target
= control target key end

     0   :  { %s4987_s30 = smov 0   ;;  %s6043_s0 = inlined_call_operand.vmem [shape: bf16[2,256,4], index: 0, kind: input, shape index: {}]   ;;  %s6044_s1 = inlined_call_operand.vmem [shape: bf16[4,4], index: 1, kind: input, shape index: {}]   ;;  %s6045_s2 = inlined_call_operand.vmem [shape: f32[1,4], index: 2, kind: input, shape index: {}]   ;;  %s6046_s3 = inlined_call_operand.vmem [shape: bf16[9,4,4], index: 3, kind: input, shape index: {}]   ;;  %s6047_s4 = inlined_call_operand.vmem [shape: f32[1,4], index: 4, kind: input, shape index: {}]   ;;  %s6048_s5 = inlined_call_operand.vmem [shape: bf16[4,16], index: 5, kind: input, shape index: {}]   ;;  %s6049_s6 = inlined_call_operand.vmem [shape: f32[1,16], index: 6, kind: input, shape index: {}]   ;;  %s6050_s7 = inlined_call_operand.vmem [shape: bf16[4,16], index: 7, kind: input, shape index: {}]   ;;  %s6051_s8 = inlined_call_operand.vmem [shape: f32[1,16], index: 8, kind: input, shape index: {}]   ;;  %s6052_s9 = inlined_call_operand.vmem [shape: f32[2,256,16], index: 9, kind: output, shape index: {}]  }
   0x1 LB: > { %s3678_s10 = sadd.s32 4294967295, %s4934_s30   ;;  %p3682_p0 = scmp.ge.s32.totalorder %s4934_s30, 1  ;;  %s4934_s30 = sphi %s4987_s30, %s19_s30  }
   0x2   : > { %p287_p1 = scmp.lt.s32.totalorder %s4934_s30, 3 }
   0x4   : > { %p288_p2 = pnand %p3682_p0, %p287_p1 }
   0x5   : > { %v366_v0 = vld [vmem:[%s6044_s1] sm:$0x3] (!%p288_p2)  ;;  %vm503_vm0 = vcmask (!%p288_p2), 1041408   ;;  %p323_p3 = scmp.lt.s32.totalorder (!%p288_p2), %s3678_s10, 1  ;;  %vm454_vm1 = vcmask (!%p288_p2), 31744   ;;  %v4936_v18 = vmov (!%p288_p2), 0.0  }
   0x6   : > { %291 = sbr.rel (%p288_p2) target bundleno = 1132 (0x46c), region = 56  ;;  %4875 = vmatprep.subr.msk.bf16.mxu0 (!%p288_p2), %vm503_vm0, %v366_v0  ;;  %v505_v1 = vsel (!%p288_p2), %vm503_vm0, %v366_v0, 0  ;;  %707 = vst.msk [vmem:[#allocation2 + $0x30] sm:$0xff] (!%p288_p2), %vm454_vm1, %v4936_v18  ;;  %708 = vst.msk [vmem:[#allocation2 + $0x38] sm:$0xff] (!%p288_p2), %vm454_vm1, %v4936_v18  ;;  %vm702_vm2 = vcmask (!%p288_p2), 25600   ;;  %vm1514_vm4 = vcmask (!%p288_p2), 1046528  }
   0x7   : > { %4116 = vmatpush3.bf16.msra.mxu0 (!%p288_p2), %v505_v1  ;;  %700 = vst.msk [vmem:[#allocation2] sm:$0xff] (!%p288_p2), %vm454_vm1, %v4936_v18  ;;  %701 = vst.msk [vmem:[#allocation2 + $0x8] sm:$0xff] (!%p288_p2), %vm454_vm1, %v4936_v18  ;;  %v3770_v19 = vld [vmem:[%s6046_s3 + $0x6] sm:$0x3] (!%p288_p2)  ;;  %v3720_v30 = vld [vmem:[%s6046_s3 + $0x2] sm:$0x3] (!%p288_p2) }
   0x8   : > { %704 = vst.msk [vmem:[#allocation2 + $0x18] sm:$0xff] (!%p288_p2), %vm454_vm1, %v4936_v18  ;;  %705 = vst.msk [vmem:[#allocation2 + $0x20] sm:$0xff] (!%p288_p2), %vm454_vm1, %v4936_v18  ;;  %4879 = vmatprep.subr.msk.bf16.mxu1 (!%p288_p2), %vm503_vm0, %v3770_v19  ;;  %v1815_v22 = vsel (!%p288_p2), %vm503_vm0, %v3770_v19, 0  ;;  %4876 = vmatprep.subr.msk.bf16.mxu0 (!%p288_p2), %vm503_vm0, %v3720_v30  ;;  %v1123_v31 = vsel (!%p288_p2), %vm503_vm0, %v3720_v30, 0  ;;  %vm879_vm3 = vsmask.f32 (!%p288_p2), 7424 }
   0x9   : > { %710 = vst.msk [vmem:[#allocation2 + $0x48] sm:$0xff] (!%p288_p2), %vm454_vm1, %v4936_v18  ;;  %711 = vst.msk [vmem:[#allocation2 + $0x50] sm:$0xff] (!%p288_p2), %vm454_vm1, %v4936_v18  ;;  %4252 = vmatpush3.bf16.msra.mxu1 (!%p288_p2), %v1815_v22  ;;  %v3787_v34 = vld [vmem:[%s6046_s3 + $0x8] sm:$0x3] (!%p288_p2)  ;;  %v5120_v36 = vld [vmem:[%s6046_s3] sm:$0x3] (!%p288_p2) }
   0xa   : > { %713 = vst.msk [vmem:[#allocation2 + $0x60] sm:$0xff] (!%p288_p2), %vm454_vm1, %v4936_v18  ;;  %714 = vst.msk [vmem:[#allocation2 + $0x68] sm:$0xff] (!%p288_p2), %vm454_vm1, %v4936_v18  ;;  %4880 = vmatprep.subr.msk.bf16.mxu1 (!%p288_p2), %vm503_vm0, %v3787_v34  ;;  %v5127_v37 = vld [vmem:[%s6045_s2] ss:$0 sm:$0xff] (!%p288_p2)  ;;  %vm3590_vm5 = vcmask (!%p288_p2), 130048  }
   0xb   : > { %716 = vst.msk [vmem:[#allocation2 + $0x78] sm:$0xff] (!%p288_p2), %vm454_vm1, %v4936_v18  ;;  %717 = vst.msk [vmem:[#allocation2 + $0x80] sm:$0xff] (!%p288_p2), %vm454_vm1, %v4936_v18 }
   0xc   : > { %719 = vst.msk [vmem:[#allocation2 + $0x90] sm:$0xff] (!%p288_p2), %vm454_vm1, %v4936_v18  ;;  %720 = vst.msk [vmem:[#allocation2 + $0x98] sm:$0xff] (!%p288_p2), %vm454_vm1, %v4936_v18 }
   0xd   : > { %s6054_s10 = smov (!%p323_p3, %s3678_s10), 1  ;;  %722 = vst.msk [vmem:[#allocation2 + $0xa8] sm:$0xff] %vm454_vm1, %v4936_v18  ;;  %723 = vst.msk [vmem:[#allocation2 + $0xb0] sm:$0xff] %vm454_vm1, %v4936_v18 }
   0xe   : > { %s3909_s13 = sshll.u32 %s6054_s10, 7  ;;  %725 = vst.msk [vmem:[#allocation2 + $0xc0] sm:$0xff] %vm454_vm1, %v4936_v18  ;;  %726 = vst.msk [vmem:[#allocation2 + $0xc8] sm:$0xff] %vm454_vm1, %v4936_v18  ;;  %v788_v20 = vld [vmem:[#allocation2] sm:$0xff]  ;;  %v789_v21 = vld [vmem:[#allocation2 + $0x8] sm:$0xff]  ;;  %s3910_s29 = sshll.u32 %s6054_s10, 8 }
   0xf   : > { %s5006_s16 = scalar_lea.vmem %s6043_s0, %s3909_s13  ;;  %728 = vst.msk [vmem:[#allocation2 + $0xd8] sm:$0xff] %vm454_vm1, %v4936_v18  ;;  %729 = vst.msk [vmem:[#allocation2 + $0xe0] sm:$0xff] %vm454_vm1, %v4936_v18  ;;  %v5099_v23 = vpack.c.bf16 %v789_v21, %v788_v20  ;;  %s5945_s12 = scalar_lea.vmem %s6052_s9, %s3910_s29 }
  0x10   : > { %v4896_v2 = vld [vmem:[%s5006_s16] sm:$0xff]   ;;  %v4897_v3 = vld [vmem:[%s5006_s16 + $0x8] sm:$0xff]   ;;  %v4898_v4 = vld [vmem:[%s5006_s16 + $0x10] sm:$0xff]   ;;  %731 = vst.msk [vmem:[#allocation2 + $0xf0] sm:$0xff] %vm454_vm1, %v4936_v18 }
  0x11   : > { %4117 = vmatprep.mubr.msk.bf16.mxu0 %vm454_vm1, %v4896_v2  ;;  %v4899_v5 = vld [vmem:[%s5006_s16 + $0x18] sm:$0xff]   ;;  %v4900_v6 = vld [vmem:[%s5006_s16 + $0x20] sm:$0xff]   ;;  %v4901_v7 = vld [vmem:[%s5006_s16 + $0x28] sm:$0xff]   ;;  %732 = vst.msk [vmem:[#allocation2 + $0xf8] sm:$0xff] %vm454_vm1, %v4936_v18  ;;  %v883_v26 = vshll.u32 %v5099_v23, 16  ;;  %v881_v27 = vshrl.u32 %v5099_v23, 16 }
  0x12   : > { %4118 = vmatmul.mubr.msk.bf16.vlgmr.msra.gmra.mrb[0].mxu0 %vm454_vm1, %v4897_v3  ;;  %v4902_v8 = vld [vmem:[%s5006_s16 + $0x30] sm:$0xff]   ;;  %v4903_v9 = vld [vmem:[%s5006_s16 + $0x38] sm:$0xff]   ;;  %v4904_v10 = vld [vmem:[%s5006_s16 + $0x40] sm:$0xff]   ;;  %734 = vst.msk [vmem:[#allocation2 + $0x108] sm:$0xff] %vm454_vm1, %v4936_v18 }
  0x13   : > { %4121 = vmatprep.mubr.msk.bf16.mxu0 %vm454_vm1, %v4898_v4  ;;  %v4905_v11 = vld [vmem:[%s5006_s16 + $0x48] sm:$0xff]   ;;  %v4906_v12 = vld [vmem:[%s5006_s16 + $0x50] sm:$0xff]   ;;  %v4907_v13 = vld [vmem:[%s5006_s16 + $0x58] sm:$0xff]   ;;  %735 = vst.msk [vmem:[#allocation2 + $0x110] sm:$0xff] %vm454_vm1, %v4936_v18  ;;  %v885_v28 = vrot.slane %v883_v26, 1  ;;  %4150 = vmatpush3.bf16.msra.mxu0 %v1123_v31 }
  0x14   : > { %v4908_v14 = vld [vmem:[%s5006_s16 + $0x60] sm:$0xff]   ;;  %v4909_v15 = vld [vmem:[%s5006_s16 + $0x68] sm:$0xff]   ;;  %v4910_v16 = vld [vmem:[%s5006_s16 + $0x70] sm:$0xff]   ;;  %737 = vst.msk [vmem:[#allocation2 + $0x120] sm:$0xff] %vm454_vm1, %v4936_v18  ;;  %4877 = vmatprep.subr.msk.bf16.mxu0 %vm503_vm0, %v5120_v36 }
  0x15   : > { %v4911_v17 = vld [vmem:[%s5006_s16 + $0x78] sm:$0xff]   ;;  %738 = vst.msk [vmem:[#allocation2 + $0x128] sm:$0xff] %vm454_vm1, %v4936_v18  ;;  %740 = vst.msk [vmem:[#allocation2 + $0x138] sm:$0xff] %vm454_vm1, %v4936_v18  ;;  %v886_v32 = vor.u32 %v885_v28, %v881_v27 }
  0x16   : > { %741 = vst.msk [vmem:[#allocation2 + $0x140] sm:$0xff] %vm454_vm1, %v4936_v18  ;;  %743 = vst.msk [vmem:[#allocation2 + $0x150] sm:$0xff] %vm454_vm1, %v4936_v18 }
  0x17   : > { %744 = vst.msk [vmem:[#allocation2 + $0x158] sm:$0xff] %vm454_vm1, %v4936_v18  ;;  %746 = vst.msk [vmem:[#allocation2 + $0x168] sm:$0xff] %vm454_vm1, %v4936_v18 }
  0x18   : > { %747 = vst.msk [vmem:[#allocation2 + $0x170] sm:$0xff] %vm454_vm1, %v4936_v18  ;;  %749 = vst.msk [vmem:[#allocation2 + $0x180] sm:$0xff] %vm454_vm1, %v4936_v18 }
  0x19   : > { %750 = vst.msk [vmem:[#allocation2 + $0x188] sm:$0xff] %vm454_vm1, %v4936_v18  ;;  %752 = vst.msk [vmem:[#allocation2 + $0x198] sm:$0xff] %vm454_vm1, %v4936_v18 }
  0x1a   : > { %4122 = vmatmul.mubr.msk.bf16.gmra.mrb[4].mxu0 %vm454_vm1, %v4899_v5  ;;  %753 = vst.msk [vmem:[#allocation2 + $0x1a0] sm:$0xff] %vm454_vm1, %v4936_v18 }
  0x1b   : > { %4125 = vmatprep.mubr.msk.bf16.mxu0 %vm454_vm1, %v4900_v6  ;;  %709 = vst.msk [vmem:[#allocation2 + $0x40] sm:$0x3] %vm702_vm2, %v4936_v18  ;;  %703 = vst.msk [vmem:[#allocation2 + $0x10] sm:$0x3] %vm702_vm2, %v4936_v18 }
  0x1c   : > { %706 = vst.msk [vmem:[#allocation2 + $0x28] sm:$0x3] %vm702_vm2, %v4936_v18  ;;  %712 = vst.msk [vmem:[#allocation2 + $0x58] sm:$0x3] %vm702_vm2, %v4936_v18 }
  0x1d   : > { %715 = vst.msk [vmem:[#allocation2 + $0x70] sm:$0x3] %vm702_vm2, %v4936_v18  ;;  %718 = vst.msk [vmem:[#allocation2 + $0x88] sm:$0x3] %vm702_vm2, %v4936_v18 }
  0x1e   : > { %721 = vst.msk [vmem:[#allocation2 + $0xa0] sm:$0x3] %vm702_vm2, %v4936_v18  ;;  %724 = vst.msk [vmem:[#allocation2 + $0xb8] sm:$0x3] %vm702_vm2, %v4936_v18 }
  0x1f   : > { %727 = vst.msk [vmem:[#allocation2 + $0xd0] sm:$0x3] %vm702_vm2, %v4936_v18  ;;  %730 = vst.msk [vmem:[#allocation2 + $0xe8] sm:$0x3] %vm702_vm2, %v4936_v18 }
  0x20   : > { %733 = vst.msk [vmem:[#allocation2 + $0x100] sm:$0x3] %vm702_vm2, %v4936_v18  ;;  %736 = vst.msk [vmem:[#allocation2 + $0x118] sm:$0x3] %vm702_vm2, %v4936_v18 }
  0x21   : > { %739 = vst.msk [vmem:[#allocation2 + $0x130] sm:$0x3] %vm702_vm2, %v4936_v18  ;;  %742 = vst.msk [vmem:[#allocation2 + $0x148] sm:$0x3] %vm702_vm2, %v4936_v18 }
  0x22   : > { %4126 = vmatmul.mubr.msk.bf16.gmra.mrb[8].mxu0 %vm454_vm1, %v4901_v7  ;;  %745 = vst.msk [vmem:[#allocation2 + $0x160] sm:$0x3] %vm702_vm2, %v4936_v18  ;;  %748 = vst.msk [vmem:[#allocation2 + $0x178] sm:$0x3] %vm702_vm2, %v4936_v18  ;;  %v790_v24 = vld [vmem:[#allocation2 + $0x10] sm:$0x3] }
  0x23   : > { %4129 = vmatprep.mubr.msk.bf16.mxu0 %vm454_vm1, %v4902_v8  ;;  %751 = vst.msk [vmem:[#allocation2 + $0x190] sm:$0x3] %vm702_vm2, %v4936_v18  ;;  %754 = vst.msk [vmem:[#allocation2 + $0x1a8] sm:$0x3] %vm702_vm2, %v4936_v18  ;;  %v5101_v25 = vpack.c.bf16 %v790_v24, %v790_v24  ;;  %v5165_v18 = vld [vmem:[%s6046_s3 + $0xa] sm:$0x3] }
  0x25   : > { %v888_v29 = vshll.u32 %v5101_v25, 16 }
  0x27   : > { %v890_v33 = vrot.slane %v888_v29, 1 }
  0x29   : > { %v891_v35 = vsel %vm879_vm3, %v886_v32, %v890_v33 }
  0x2a   : > { %4130 = vmatmul.mubr.msk.bf16.gmra.mrb[12].mxu0 %vm454_vm1, %v4903_v9 }
  0x2b   : > { %4133 = vmatprep.mubr.msk.bf16.mxu0 %vm454_vm1, %v4904_v10 }
  0x32   : > { %4134 = vmatmul.mubr.msk.bf16.gmra.mrb[16].mxu0 %vm454_vm1, %v4905_v11  ;;  %v2027_v11 = vsel %vm503_vm0, %v3787_v34, 0 }
  0x33   : > { %4137 = vmatprep.mubr.msk.bf16.mxu0 %vm454_vm1, %v4906_v12 }
  0x3a   : > { %4138 = vmatmul.mubr.msk.bf16.gmra.mrb[20].mxu0 %vm454_vm1, %v4907_v13 }
  0x3b   : > { %4141 = vmatprep.mubr.msk.bf16.mxu0 %vm454_vm1, %v4908_v14 }
  0x42   : > { %4142 = vmatmul.mubr.msk.bf16.gmra.mrb[24].mxu0 %vm454_vm1, %v4909_v15 }
  0x43   : > { %4145 = vmatprep.mubr.msk.bf16.mxu0 %vm454_vm1, %v4910_v16 }
  0x4a   : > { %4146 = vmatmul.mubr.msk.bf16.gmra.mrb[28].mxu0 %vm454_vm1, %v4911_v17 }
  0x4b   : > { %4151 = vmatprep.mubr.msk.bf16.mxu0 %vm454_vm1, %v891_v35 }
  0xe5   : > { %v4119_v38 = vpop.f32.mrb[0].mxu0 }
  0xe6   : > { %v550_v39 = vadd.f32 %v4119_v38, %v5127_v37  ;;  %v541_v40 = vpop.f32.mrb[1].mxu0 }
  0xe7   : > { %v542_v41 = vadd.f32 %v5127_v37, %v541_v40  ;;  %v4120_v42 = vpop.f32.mrb[2].mxu0 }
  0xe8   : > { %v670_v43 = vmax.f32 %v550_v39, 0.0  ;;  %v553_v44 = vadd.f32 %v4120_v42, %v5127_v37  ;;  %v544_v45 = vpop.f32.mrb[3].mxu0 }
  0xe9   : > { %v668_v46 = vmax.f32 %v542_v41, 0.0  ;;  %v545_v47 = vadd.f32 %v5127_v37, %v544_v45 }
  0xea   : > { %758 = vst.msk [vmem:[#allocation2 + $0x31] sm:$0xff] %vm454_vm1, %v670_v43  ;;  %v671_v48 = vmax.f32 %v553_v44, 0.0 }
  0xeb   : > { %756 = vst.msk [vmem:[#allocation2 + $0x19] sm:$0xff] %vm454_vm1, %v668_v46  ;;  %v669_v49 = vmax.f32 %v545_v47, 0.0 }
  0xec   : > { %759 = vst.msk [vmem:[#allocation2 + $0x39] sm:$0xff] %vm454_vm1, %v671_v48 }
  0xed   : > { %757 = vst.msk [vmem:[#allocation2 + $0x21] sm:$0xff] %vm454_vm1, %v669_v49  ;;  %v4123_v50 = vpop.f32.mrb[4].mxu0 }
  0xee   : > { %v566_v51 = vadd.f32 %v4123_v50, %v5127_v37  ;;  %v557_v52 = vpop.f32.mrb[5].mxu0  ;;  %v1319_v50 = vsel %vm503_vm0, %v5120_v36, 0 }
  0xef   : > { %v558_v53 = vadd.f32 %v5127_v37, %v557_v52  ;;  %v4124_v54 = vpop.f32.mrb[6].mxu0 }
  0xf0   : > { %v674_v55 = vmax.f32 %v566_v51, 0.0  ;;  %v569_v56 = vadd.f32 %v4124_v54, %v5127_v37  ;;  %v560_v57 = vpop.f32.mrb[7].mxu0 }
  0xf1   : > { %v672_v58 = vmax.f32 %v558_v53, 0.0  ;;  %v561_v59 = vadd.f32 %v5127_v37, %v560_v57  ;;  %v794_v62 = vld [vmem:[#allocation2 + $0x30] sm:$0xff] }
  0xf2   : > { %762 = vst.msk [vmem:[#allocation2 + $0x61] sm:$0xff] %vm454_vm1, %v674_v55  ;;  %v675_v60 = vmax.f32 %v569_v56, 0.0  ;;  %v791_v1 = vld [vmem:[#allocation2 + $0x18] sm:$0xff]  ;;  %v5202_v55 = vld [vmem:[%s6046_s3 + $0x4] sm:$0x3] }
  0xf3   : > { %760 = vst.msk [vmem:[#allocation2 + $0x49] sm:$0xff] %vm454_vm1, %v672_v58  ;;  %v673_v61 = vmax.f32 %v561_v59, 0.0  ;;  %v795_v63 = vld [vmem:[#allocation2 + $0x38] sm:$0xff]  ;;  %v796_v0 = vld [vmem:[#allocation2 + $0x40] sm:$0x3] }
  0xf4   : > { %763 = vst.msk [vmem:[#allocation2 + $0x69] sm:$0xff] %vm454_vm1, %v675_v60  ;;  %v792_v2 = vld [vmem:[#allocation2 + $0x20] sm:$0xff]  ;;  %v5144_v3 = vpack.c.bf16 %v795_v63, %v794_v62  ;;  %v793_v4 = vld [vmem:[#allocation2 + $0x28] sm:$0x3]  ;;  %v5146_v5 = vpack.c.bf16 %v796_v0, %v796_v0 }
  0xf5   : > { %761 = vst.msk [vmem:[#allocation2 + $0x51] sm:$0xff] %vm454_vm1, %v673_v61  ;;  %v4127_v6 = vpop.f32.mrb[8].mxu0  ;;  %v5149_v7 = vpack.c.bf16 %v792_v2, %v791_v1  ;;  %v5151_v8 = vpack.c.bf16 %v793_v4, %v793_v4 }
  0xf6   : > { %v582_v9 = vadd.f32 %v4127_v6, %v5127_v37  ;;  %v573_v10 = vpop.f32.mrb[9].mxu0  ;;  %v907_v12 = vshll.u32 %v5144_v3, 16  ;;  %v905_v17 = vshrl.u32 %v5144_v3, 16  ;;  %v912_v24 = vshll.u32 %v5146_v5, 16 }
  0xf7   : > { %v574_v13 = vadd.f32 %v5127_v37, %v573_v10  ;;  %v4128_v14 = vpop.f32.mrb[10].mxu0  ;;  %4253 = vmatprep.mubr.msk.bf16.mxu1 %vm454_vm1, %v5149_v7  ;;  %v895_v15 = vshll.u32 %v5149_v7, 16  ;;  %v900_v16 = vshll.u32 %v5151_v8, 16  ;;  %v893_v28 = vshrl.u32 %v5149_v7, 16 }
  0xf8   : > { %v678_v19 = vmax.f32 %v582_v9, 0.0  ;;  %v585_v20 = vadd.f32 %v4128_v14, %v5127_v37  ;;  %v576_v21 = vpop.f32.mrb[11].mxu0  ;;  %4254 = vmatmul.mubr.msk.bf16.vlgmr.msra.gmra.mrb[0].mxu1 %vm454_vm1, %v5144_v3  ;;  %v909_v22 = vrot.slane %v907_v12, 1  ;;  %v914_v40 = vrot.slane %v912_v24, 1 }
  0xf9   : > { %v676_v26 = vmax.f32 %v574_v13, 0.0  ;;  %v577_v27 = vadd.f32 %v5127_v37, %v576_v21  ;;  %4286 = vmatpush3.bf16.msra.mxu1 %v2027_v11  ;;  %v897_v29 = vrot.slane %v895_v15, 1  ;;  %v902_v34 = vrot.slane %v900_v16, 1  ;;  %v800_v35 = vld [vmem:[#allocation2 + $0x60] sm:$0xff] }
  0xfa   : > { %766 = vst.msk [vmem:[#allocation2 + $0x91] sm:$0xff] %vm454_vm1, %v678_v19  ;;  %v679_v30 = vmax.f32 %v585_v20, 0.0  ;;  %v910_v31 = vor.u32 %v909_v22, %v905_v17  ;;  %4881 = vmatprep.subr.msk.bf16.mxu1 %vm503_vm0, %v5165_v18  ;;  %v797_v41 = vld [vmem:[#allocation2 + $0x48] sm:$0xff] }
  0xfb   : > { %764 = vst.msk [vmem:[#allocation2 + $0x79] sm:$0xff] %vm454_vm1, %v676_v26  ;;  %v677_v32 = vmax.f32 %v577_v27, 0.0  ;;  %v898_v33 = vor.u32 %v897_v29, %v893_v28  ;;  %v801_v38 = vld [vmem:[#allocation2 + $0x68] sm:$0xff]  ;;  %v802_v39 = vld [vmem:[#allocation2 + $0x70] sm:$0x3] }
  0xfc   : > { %767 = vst.msk [vmem:[#allocation2 + $0x99] sm:$0xff] %vm454_vm1, %v679_v30  ;;  %v798_v42 = vld [vmem:[#allocation2 + $0x50] sm:$0xff]  ;;  %v5178_v43 = vpack.c.bf16 %v801_v38, %v800_v35  ;;  %v799_v44 = vld [vmem:[#allocation2 + $0x58] sm:$0x3]  ;;  %v5180_v45 = vpack.c.bf16 %v802_v39, %v802_v39  ;;  %v5196_v53 = vsel %vm879_vm3, %v910_v31, %v914_v40 }
  0xfd   : > { %765 = vst.msk [vmem:[#allocation2 + $0x81] sm:$0xff] %vm454_vm1, %v677_v32  ;;  %v4131_v46 = vpop.f32.mrb[12].mxu0  ;;  %v5184_v47 = vsel %vm879_vm3, %v898_v33, %v902_v34  ;;  %v5186_v48 = vpack.c.bf16 %v798_v42, %v797_v41  ;;  %v5188_v49 = vpack.c.bf16 %v799_v44, %v799_v44 }
  0xfe   : > { %v598_v51 = vadd.f32 %v4131_v46, %v5127_v37  ;;  %v589_v52 = vpop.f32.mrb[13].mxu0  ;;  %4152 = vmatmul.mubr.msk.bf16.vlgmr.msra.gmra.mrb[32].mxu0 %vm454_vm1, %v5184_v47  ;;  %v931_v54 = vshll.u32 %v5178_v43, 16  ;;  %v929_v59 = vshrl.u32 %v5178_v43, 16  ;;  %v936_v0 = vshll.u32 %v5180_v45, 16 }
  0xff   : > { %v590_v56 = vadd.f32 %v5127_v37, %v589_v52  ;;  %v4132_v57 = vpop.f32.mrb[14].mxu0  ;;  %4155 = vmatprep.mubr.msk.bf16.mxu0 %vm454_vm1, %v5196_v53  ;;  %4257 = vmatprep.mubr.msk.bf16.mxu1 %vm454_vm1, %v5186_v48  ;;  %v919_v36 = vshll.u32 %v5186_v48, 16  ;;  %v924_v58 = vshll.u32 %v5188_v49, 16  ;;  %v917_v4 = vshrl.u32 %v5186_v48, 16 }
 0x100   : > { %v682_v60 = vmax.f32 %v598_v51, 0.0  ;;  %v601_v61 = vadd.f32 %v4132_v57, %v5127_v37  ;;  %v592_v62 = vpop.f32.mrb[15].mxu0  ;;  %4258 = vmatmul.mubr.msk.bf16.gmra.mrb[4].mxu1 %vm454_vm1, %v5178_v43  ;;  %v933_v63 = vrot.slane %v931_v54, 1  ;;  %4184 = vmatpush3.bf16.msra.mxu0 %v1319_v50  ;;  %v938_v17 = vrot.slane %v936_v0, 1 }
 0x101   : > { %v680_v1 = vmax.f32 %v590_v56, 0.0  ;;  %v593_v2 = vadd.f32 %v5127_v37, %v592_v62  ;;  %v921_v6 = vrot.slane %v919_v36, 1  ;;  %4878 = vmatprep.subr.msk.bf16.mxu0 %vm503_vm0, %v5202_v55  ;;  %v926_v13 = vrot.slane %v924_v58, 1  ;;  %v806_v14 = vld [vmem:[#allocation2 + $0x90] sm:$0xff] }
 0x102   : > { %770 = vst.msk [vmem:[#allocation2 + $0xc1] sm:$0xff] %vm454_vm1, %v682_v60  ;;  %v683_v9 = vmax.f32 %v601_v61, 0.0  ;;  %v934_v10 = vor.u32 %v933_v63, %v929_v59  ;;  %v803_v19 = vld [vmem:[#allocation2 + $0x78] sm:$0xff] }
 0x103   : > { %768 = vst.msk [vmem:[#allocation2 + $0xa9] sm:$0xff] %vm454_vm1, %v680_v1  ;;  %v681_v11 = vmax.f32 %v593_v2, 0.0  ;;  %v922_v12 = vor.u32 %v921_v6, %v917_v4  ;;  %v807_v15 = vld [vmem:[#allocation2 + $0x98] sm:$0xff]  ;;  %v808_v16 = vld [vmem:[#allocation2 + $0xa0] sm:$0x3] }
 0x104   : > { %771 = vst.msk [vmem:[#allocation2 + $0xc9] sm:$0xff] %vm454_vm1, %v683_v9  ;;  %v804_v20 = vld [vmem:[#allocation2 + $0x80] sm:$0xff]  ;;  %v5223_v21 = vpack.c.bf16 %v807_v15, %v806_v14  ;;  %v805_v22 = vld [vmem:[#allocation2 + $0x88] sm:$0x3]  ;;  %v5225_v24 = vpack.c.bf16 %v808_v16, %v808_v16  ;;  %v5239_v32 = vsel %vm879_vm3, %v934_v10, %v938_v17 }
 0x105   : > { %769 = vst.msk [vmem:[#allocation2 + $0xb1] sm:$0xff] %vm454_vm1, %v681_v11  ;;  %v4135_v26 = vpop.f32.mrb[16].mxu0  ;;  %v5229_v27 = vsel %vm879_vm3, %v922_v12, %v926_v13  ;;  %v5231_v28 = vpack.c.bf16 %v804_v20, %v803_v19  ;;  %v5233_v29 = vpack.c.bf16 %v805_v22, %v805_v22 }
 0x106   : > { %v614_v30 = vadd.f32 %v4135_v26, %v5127_v37  ;;  %v605_v31 = vpop.f32.mrb[17].mxu0  ;;  %4156 = vmatmul.mubr.msk.bf16.gmra.mrb[36].mxu0 %vm454_vm1, %v5229_v27  ;;  %v955_v33 = vshll.u32 %v5223_v21, 16  ;;  %v953_v40 = vshrl.u32 %v5223_v21, 16  ;;  %v960_v50 = vshll.u32 %v5225_v24, 16 }
 0x107   : > { %v606_v34 = vadd.f32 %v5127_v37, %v605_v31  ;;  %v4136_v35 = vpop.f32.mrb[18].mxu0  ;;  %4159 = vmatprep.mubr.msk.bf16.mxu0 %vm454_vm1, %v5239_v32  ;;  %4261 = vmatprep.mubr.msk.bf16.mxu1 %vm454_vm1, %v5231_v28  ;;  %v943_v38 = vshll.u32 %v5231_v28, 16  ;;  %v948_v39 = vshll.u32 %v5233_v29, 16  ;;  %v941_v54 = vshrl.u32 %v5231_v28, 16 }
 0x108   : > { %v686_v41 = vmax.f32 %v614_v30, 0.0  ;;  %v617_v42 = vadd.f32 %v4136_v35, %v5127_v37  ;;  %v608_v44 = vpop.f32.mrb[19].mxu0  ;;  %4262 = vmatmul.mubr.msk.bf16.gmra.mrb[8].mxu1 %vm454_vm1, %v5223_v21  ;;  %v957_v46 = vrot.slane %v955_v33, 1  ;;  %v962_v0 = vrot.slane %v960_v50, 1 }
 0x109   : > { %v684_v51 = vmax.f32 %v606_v34, 0.0  ;;  %v609_v52 = vadd.f32 %v5127_v37, %v608_v44  ;;  %v945_v56 = vrot.slane %v943_v38, 1  ;;  %v950_v60 = vrot.slane %v948_v39, 1  ;;  %v812_v61 = vld [vmem:[#allocation2 + $0xc0] sm:$0xff] }
 0x10a   : > { %774 = vst.msk [vmem:[#allocation2 + $0xf1] sm:$0xff] %vm454_vm1, %v686_v41  ;;  %v687_v57 = vmax.f32 %v617_v42, 0.0  ;;  %v958_v36 = vor.u32 %v957_v46, %v953_v40  ;;  %v809_v1 = vld [vmem:[#allocation2 + $0xa8] sm:$0xff] }
 0x10b   : > { %772 = vst.msk [vmem:[#allocation2 + $0xd9] sm:$0xff] %vm454_vm1, %v684_v51  ;;  %v685_v58 = vmax.f32 %v609_v52, 0.0  ;;  %v946_v59 = vor.u32 %v945_v56, %v941_v54  ;;  %v813_v62 = vld [vmem:[#allocation2 + $0xc8] sm:$0xff]  ;;  %v814_v63 = vld [vmem:[#allocation2 + $0xd0] sm:$0x3] }
 0x10c   : > { %775 = vst.msk [vmem:[#allocation2 + $0xf9] sm:$0xff] %vm454_vm1, %v687_v57  ;;  %v810_v2 = vld [vmem:[#allocation2 + $0xb0] sm:$0xff]  ;;  %v5259_v4 = vpack.c.bf16 %v813_v62, %v812_v61  ;;  %v811_v6 = vld [vmem:[#allocation2 + $0xb8] sm:$0x3]  ;;  %v5261_v9 = vpack.c.bf16 %v814_v63, %v814_v63  ;;  %v5275_v16 = vsel %vm879_vm3, %v958_v36, %v962_v0 }
 0x10d   : > { %773 = vst.msk [vmem:[#allocation2 + $0xe1] sm:$0xff] %vm454_vm1, %v685_v58  ;;  %v4139_v10 = vpop.f32.mrb[20].mxu0  ;;  %v5265_v11 = vsel %vm879_vm3, %v946_v59, %v950_v60  ;;  %v5267_v12 = vpack.c.bf16 %v810_v2, %v809_v1  ;;  %v5269_v13 = vpack.c.bf16 %v811_v6, %v811_v6 }
 0x10e   : > { %v630_v14 = vadd.f32 %v4139_v10, %v5127_v37  ;;  %v621_v15 = vpop.f32.mrb[21].mxu0  ;;  %4160 = vmatmul.mubr.msk.bf16.gmra.mrb[40].mxu0 %vm454_vm1, %v5265_v11  ;;  %v979_v17 = vshll.u32 %v5259_v4, 16  ;;  %v977_v30 = vshrl.u32 %v5259_v4, 16  ;;  %v984_v38 = vshll.u32 %v5261_v9, 16 }
 0x10f   : > { %v622_v19 = vadd.f32 %v5127_v37, %v621_v15  ;;  %v4140_v20 = vpop.f32.mrb[22].mxu0  ;;  %4163 = vmatprep.mubr.msk.bf16.mxu0 %vm454_vm1, %v5275_v16  ;;  %4265 = vmatprep.mubr.msk.bf16.mxu1 %vm454_vm1, %v5267_v12  ;;  %v967_v22 = vshll.u32 %v5267_v12, 16  ;;  %v972_v26 = vshll.u32 %v5269_v13, 16  ;;  %v965_v41 = vshrl.u32 %v5267_v12, 16 }
 0x110   : > { %v690_v31 = vmax.f32 %v630_v14, 0.0  ;;  %v633_v33 = vadd.f32 %v4140_v20, %v5127_v37  ;;  %v624_v34 = vpop.f32.mrb[23].mxu0  ;;  %4266 = vmatmul.mubr.msk.bf16.gmra.mrb[12].mxu1 %vm454_vm1, %v5259_v4  ;;  %v981_v35 = vrot.slane %v979_v17, 1  ;;  %v986_v36 = vrot.slane %v984_v38, 1 }
 0x111   : > { %v688_v39 = vmax.f32 %v622_v19, 0.0  ;;  %v625_v40 = vadd.f32 %v5127_v37, %v624_v34  ;;  %v969_v42 = vrot.slane %v967_v22, 1  ;;  %v974_v52 = vrot.slane %v972_v26, 1  ;;  %v818_v54 = vld [vmem:[#allocation2 + $0xf0] sm:$0xff] }
 0x112   : > { %778 = vst.msk [vmem:[#allocation2 + $0x121] sm:$0xff] %vm454_vm1, %v690_v31  ;;  %v691_v44 = vmax.f32 %v633_v33, 0.0  ;;  %v982_v46 = vor.u32 %v981_v35, %v977_v30  ;;  %v815_v58 = vld [vmem:[#allocation2 + $0xd8] sm:$0xff] }
 0x113   : > { %776 = vst.msk [vmem:[#allocation2 + $0x109] sm:$0xff] %vm454_vm1, %v688_v39  ;;  %v689_v50 = vmax.f32 %v625_v40, 0.0  ;;  %v970_v51 = vor.u32 %v969_v42, %v965_v41  ;;  %v819_v56 = vld [vmem:[#allocation2 + $0xf8] sm:$0xff]  ;;  %v820_v57 = vld [vmem:[#allocation2 + $0x100] sm:$0x3] }
 0x114   : > { %779 = vst.msk [vmem:[#allocation2 + $0x129] sm:$0xff] %vm454_vm1, %v691_v44  ;;  %v816_v59 = vld [vmem:[#allocation2 + $0xe0] sm:$0xff]  ;;  %v5295_v60 = vpack.c.bf16 %v819_v56, %v818_v54  ;;  %v817_v61 = vld [vmem:[#allocation2 + $0xe8] sm:$0x3]  ;;  %v5297_v62 = vpack.c.bf16 %v820_v57, %v820_v57  ;;  %v5311_v14 = vsel %vm879_vm3, %v982_v46, %v986_v36 }
 0x115   : > { %777 = vst.msk [vmem:[#allocation2 + $0x111] sm:$0xff] %vm454_vm1, %v689_v50  ;;  %v4143_v63 = vpop.f32.mrb[24].mxu0  ;;  %v5301_v0 = vsel %vm879_vm3, %v970_v51, %v974_v52  ;;  %v5303_v1 = vpack.c.bf16 %v816_v59, %v815_v58  ;;  %v5305_v2 = vpack.c.bf16 %v817_v61, %v817_v61 }
 0x116   : > { %v646_v6 = vadd.f32 %v4143_v63, %v5127_v37  ;;  %v637_v10 = vpop.f32.mrb[25].mxu0  ;;  %4164 = vmatmul.mubr.msk.bf16.gmra.mrb[44].mxu0 %vm454_vm1, %v5301_v0  ;;  %v1003_v15 = vshll.u32 %v5295_v60, 16  ;;  %v1001_v26 = vshrl.u32 %v5295_v60, 16  ;;  %v1008_v35 = vshll.u32 %v5297_v62, 16 }
 0x117   : > { %v638_v17 = vadd.f32 %v5127_v37, %v637_v10  ;;  %v4144_v19 = vpop.f32.mrb[26].mxu0  ;;  %4167 = vmatprep.mubr.msk.bf16.mxu0 %vm454_vm1, %v5311_v14  ;;  %4269 = vmatprep.mubr.msk.bf16.mxu1 %vm454_vm1, %v5303_v1  ;;  %v991_v20 = vshll.u32 %v5303_v1, 16  ;;  %v996_v22 = vshll.u32 %v5305_v2, 16  ;;  %v989_v40 = vshrl.u32 %v5303_v1, 16 }
 0x118   : > { %v694_v30 = vmax.f32 %v646_v6, 0.0  ;;  %v649_v31 = vadd.f32 %v4144_v19, %v5127_v37  ;;  %v640_v33 = vpop.f32.mrb[27].mxu0  ;;  %4270 = vmatmul.mubr.msk.bf16.gmra.mrb[16].mxu1 %vm454_vm1, %v5295_v60  ;;  %v1005_v34 = vrot.slane %v1003_v15, 1  ;;  %v1010_v57 = vrot.slane %v1008_v35, 1 }
 0x119   : > { %v692_v38 = vmax.f32 %v638_v17, 0.0  ;;  %v641_v39 = vadd.f32 %v5127_v37, %v640_v33  ;;  %v993_v41 = vrot.slane %v991_v20, 1  ;;  %v998_v51 = vrot.slane %v996_v22, 1  ;;  %v824_v52 = vld [vmem:[#allocation2 + $0x120] sm:$0xff] }
 0x11a   : > { %782 = vst.msk [vmem:[#allocation2 + $0x151] sm:$0xff] %vm454_vm1, %v694_v30  ;;  %v695_v42 = vmax.f32 %v649_v31, 0.0  ;;  %v1006_v44 = vor.u32 %v1005_v34, %v1001_v26  ;;  %v821_v36 = vld [vmem:[#allocation2 + $0x108] sm:$0xff] }
 0x11b   : > { %780 = vst.msk [vmem:[#allocation2 + $0x139] sm:$0xff] %vm454_vm1, %v692_v38  ;;  %v693_v46 = vmax.f32 %v641_v39, 0.0  ;;  %v994_v50 = vor.u32 %v993_v41, %v989_v40  ;;  %v825_v54 = vld [vmem:[#allocation2 + $0x128] sm:$0xff]  ;;  %v826_v56 = vld [vmem:[#allocation2 + $0x130] sm:$0x3] }
 0x11c   : > { %783 = vst.msk [vmem:[#allocation2 + $0x159] sm:$0xff] %vm454_vm1, %v695_v42  ;;  %v822_v58 = vld [vmem:[#allocation2 + $0x110] sm:$0xff]  ;;  %v5331_v59 = vpack.c.bf16 %v825_v54, %v824_v52  ;;  %v823_v61 = vld [vmem:[#allocation2 + $0x118] sm:$0x3]  ;;  %v5333_v63 = vpack.c.bf16 %v826_v56, %v826_v56  ;;  %v5347_v22 = vsel %vm879_vm3, %v1006_v44, %v1010_v57 }
 0x11d   : > { %781 = vst.msk [vmem:[#allocation2 + $0x141] sm:$0xff] %vm454_vm1, %v693_v46  ;;  %v4147_v6 = vpop.f32.mrb[28].mxu0  ;;  %v5337_v10 = vsel %vm879_vm3, %v994_v50, %v998_v51  ;;  %v5339_v15 = vpack.c.bf16 %v822_v58, %v821_v36  ;;  %v5341_v17 = vpack.c.bf16 %v823_v61, %v823_v61 }
 0x11e   : > { %v662_v19 = vadd.f32 %v4147_v6, %v5127_v37  ;;  %v653_v20 = vpop.f32.mrb[29].mxu0  ;;  %4168 = vmatmul.mubr.msk.bf16.gmra.mrb[48].mxu0 %vm454_vm1, %v5337_v10  ;;  %v1027_v26 = vshll.u32 %v5331_v59, 16  ;;  %v1025_v35 = vshrl.u32 %v5331_v59, 16  ;;  %v1032_v42 = vshll.u32 %v5333_v63, 16 }
 0x11f   : > { %v654_v30 = vadd.f32 %v5127_v37, %v653_v20  ;;  %v4148_v31 = vpop.f32.mrb[30].mxu0  ;;  %4171 = vmatprep.mubr.msk.bf16.mxu0 %vm454_vm1, %v5347_v22  ;;  %4273 = vmatprep.mubr.msk.bf16.mxu1 %vm454_vm1, %v5339_v15  ;;  %v1015_v33 = vshll.u32 %v5339_v15, 16  ;;  %v1020_v34 = vshll.u32 %v5341_v17, 16  ;;  %v1013_v50 = vshrl.u32 %v5339_v15, 16 }
 0x120   : > { %v698_v38 = vmax.f32 %v662_v19, 0.0  ;;  %v665_v39 = vadd.f32 %v4148_v31, %v5127_v37  ;;  %v656_v40 = vpop.f32.mrb[31].mxu0  ;;  %4274 = vmatmul.mubr.msk.bf16.gmra.mrb[20].mxu1 %vm454_vm1, %v5331_v59  ;;  %v1029_v41 = vrot.slane %v1027_v26, 1  ;;  %v1034_v19 = vrot.slane %v1032_v42, 1 }
 0x121   : > { %v696_v44 = vmax.f32 %v654_v30, 0.0  ;;  %v657_v46 = vadd.f32 %v5127_v37, %v656_v40  ;;  %v1017_v51 = vrot.slane %v1015_v33, 1  ;;  %v1022_v36 = vrot.slane %v1020_v34, 1  ;;  %v830_v58 = vld [vmem:[#allocation2 + $0x150] sm:$0xff] }
 0x122   : > { %786 = vst.msk [vmem:[#allocation2 + $0x181] sm:$0xff] %vm454_vm1, %v698_v38  ;;  %v699_v52 = vmax.f32 %v665_v39, 0.0  ;;  %v1030_v54 = vor.u32 %v1029_v41, %v1025_v35  ;;  %v827_v20 = vld [vmem:[#allocation2 + $0x138] sm:$0xff] }
 0x123   : > { %784 = vst.msk [vmem:[#allocation2 + $0x169] sm:$0xff] %vm454_vm1, %v696_v44  ;;  %v697_v56 = vmax.f32 %v657_v46, 0.0  ;;  %v1018_v57 = vor.u32 %v1017_v51, %v1013_v50  ;;  %v831_v61 = vld [vmem:[#allocation2 + $0x158] sm:$0xff]  ;;  %v832_v6 = vld [vmem:[#allocation2 + $0x160] sm:$0x3] }
 0x124   : > { %787 = vst.msk [vmem:[#allocation2 + $0x189] sm:$0xff] %vm454_vm1, %v699_v52  ;;  %v828_v37 = vld [vmem:[#allocation2 + $0x140] sm:$0xff]  ;;  %v5367_v26 = vpack.c.bf16 %v831_v61, %v830_v58  ;;  %v829_v30 = vld [vmem:[#allocation2 + $0x148] sm:$0x3]  ;;  %v5369_v31 = vpack.c.bf16 %v832_v6, %v832_v6  ;;  %v5382_v38 = vsel %vm879_vm3, %v1030_v54, %v1034_v19 }
 0x125   : > { %785 = vst.msk [vmem:[#allocation2 + $0x171] sm:$0xff] %vm454_vm1, %v697_v56  ;;  %v5373_v33 = vsel %vm879_vm3, %v1018_v57, %v1022_v36  ;;  %v5375_v35 = vpack.c.bf16 %v828_v37, %v827_v20  ;;  %v5377_v34 = vpack.c.bf16 %v829_v30, %v829_v30 }
 0x126   : > { %4172 = vmatmul.mubr.msk.bf16.gmra.mrb[52].mxu0 %vm454_vm1, %v5373_v33  ;;  %v1051_v39 = vshll.u32 %v5367_v26, 16  ;;  %v1049_v42 = vshrl.u32 %v5367_v26, 16  ;;  %v1056_v46 = vshll.u32 %v5369_v31, 16 }
 0x127   : > { %4175 = vmatprep.mubr.msk.bf16.mxu0 %vm454_vm1, %v5382_v38  ;;  %4277 = vmatprep.mubr.msk.bf16.mxu1 %vm454_vm1, %v5375_v35  ;;  %v1039_v40 = vshll.u32 %v5375_v35, 16  ;;  %v1044_v41 = vshll.u32 %v5377_v34, 16  ;;  %v1037_v50 = vshrl.u32 %v5375_v35, 16 }
 0x128   : > { %4278 = vmatmul.mubr.msk.bf16.gmra.mrb[24].mxu1 %vm454_vm1, %v5367_v26  ;;  %v1053_v44 = vrot.slane %v1051_v39, 1  ;;  %v1058_v36 = vrot.slane %v1056_v46, 1 }
 0x129   : > { %v1041_v51 = vrot.slane %v1039_v40, 1  ;;  %v1046_v56 = vrot.slane %v1044_v41, 1  ;;  %v836_v37 = vld [vmem:[#allocation2 + $0x180] sm:$0xff] }
 0x12a   : > { %v1054_v52 = vor.u32 %v1053_v44, %v1049_v42  ;;  %v833_v58 = vld [vmem:[#allocation2 + $0x168] sm:$0xff] }
 0x12b   : > { %v1042_v54 = vor.u32 %v1041_v51, %v1037_v50  ;;  %v837_v57 = vld [vmem:[#allocation2 + $0x188] sm:$0xff] }
 0x12c   : > { %v834_v61 = vld [vmem:[#allocation2 + $0x170] sm:$0xff]  ;;  %v835_v6 = vld [vmem:[#allocation2 + $0x178] sm:$0x3]  ;;  %v5406_v39 = vsel %vm879_vm3, %v1054_v52, %v1058_v36  ;;  %v5408_v40 = vpack.c.bf16 %v837_v57, %v836_v37  ;;  %v1518_v37 = vrot.slane %v5149_v7, 1 }
 0x12d   : > { %v5397_v19 = vsel %vm879_vm3, %v1042_v54, %v1046_v56  ;;  %v5399_v20 = vpack.c.bf16 %v834_v61, %v833_v58  ;;  %v5401_v30 = vpack.c.bf16 %v835_v6, %v835_v6  ;;  %v2233_v54 = vsel %vm503_vm0, %v5165_v18, 0  ;;  %v838_v18 = vld [vmem:[#allocation2 + $0x190] sm:$0x3] }
 0x12e   : > { %4176 = vmatmul.mubr.msk.bf16.gmra.mrb[56].mxu0 %vm454_vm1, %v5397_v19  ;;  %v1614_v56 = vsel %vm503_vm0, %v5202_v55, 0  ;;  %v2012_v55 = vshll.u32 %v5408_v40, 16  ;;  %v5481_v57 = vpack.c.bf16 %v838_v18, %v838_v18  ;;  %v2010_v58 = vshrl.u32 %v5408_v40, 16 }
 0x12f   : > { %4179 = vmatprep.mubr.msk.bf16.mxu0 %vm454_vm1, %v5406_v39  ;;  %4281 = vmatprep.mubr.msk.bf16.mxu1 %vm454_vm1, %v5399_v20  ;;  %v1063_v41 = vshll.u32 %v5399_v20, 16  ;;  %v1068_v42 = vshll.u32 %v5401_v30, 16  ;;  %v1061_v44 = vshrl.u32 %v5399_v20, 16 }
 0x130   : > { %4282 = vmatmul.mubr.msk.bf16.gmra.mrb[28].mxu1 %vm454_vm1, %v5408_v40  ;;  %v2014_v36 = vrot.slane %v2012_v55, 1  ;;  %v2017_v61 = vshll.u32 %v5481_v57, 16 }
 0x131   : > { %4287 = vmatprep.mubr.msk.bf16.mxu1 %vm454_vm1, %v5184_v47  ;;  %v1065_v46 = vrot.slane %v1063_v41, 1  ;;  %v1070_v51 = vrot.slane %v1068_v42, 1  ;;  %v3821_v47 = vld [vmem:[%s6046_s3 + $0xc] sm:$0x3]  ;;  %v1519_v41 = vrot.slane %v5151_v8, 1  ;;  %v1516_v8 = vrot.slane %v5101_v25, 1 }
 0x132   : > { %v2015_v6 = vor.u32 %v2014_v36, %v2010_v58  ;;  %v2019_v42 = vrot.slane %v2017_v61, 1  ;;  %v2434_v55 = vsel %vm503_vm0, %v3821_v47, 0  ;;  %v5523_v25 = vld [vmem:[%s6046_s3 + $0xe] sm:$0x3]  ;;  %v1530_v36 = vrot.slane %v5231_v28, 1 }
 0x133   : > { %v1066_v50 = vor.u32 %v1065_v46, %v1061_v44  ;;  %v1520_v46 = vsel %vm1514_vm4, %v1518_v37, %v1519_v41  ;;  %v1531_v58 = vrot.slane %v5233_v29, 1  ;;  %v1534_v29 = vrot.slane %v5225_v24, 1 }
 0x134   : > { %v5500_v44 = vsel %vm879_vm3, %v2015_v6, %v2019_v42  ;;  %v1536_v37 = vrot.slane %v5267_v12, 1  ;;  %v1537_v41 = vrot.slane %v5269_v13, 1  ;;  %v1539_v24 = vrot.slane %v5259_v4, 1 }
 0x135   : > { %v5422_v52 = vsel %vm879_vm3, %v1066_v50, %v1070_v51  ;;  %v1522_v50 = vrot.slane %v5146_v5, 1  ;;  %v1521_v51 = vrot.slane %v5144_v3, 1  ;;  %v5547_v6 = vsel %vm1514_vm4, %v1530_v36, %v1531_v58 }
 0x136   : > { %4180 = vmatmul.mubr.msk.bf16.gmra.mrb[60].mxu0 %vm454_vm1, %v5422_v52  ;;  %v1540_v13 = vrot.slane %v5261_v9, 1  ;;  %v1545_v9 = vrot.slane %v5295_v60, 1 }
 0x137   : > { %4185 = vmatprep.mubr.msk.bf16.mxu0 %vm454_vm1, %v5099_v23 }
 0x138   : > { %4288 = vmatmul.mubr.msk.bf16.vlgmr.msra.gmra.mrb[0].mxu1 %vm454_vm1, %v5196_v53 }
 0x139   : > { %4320 = vmatpush3.bf16.msra.mxu1 %v2233_v54  ;;  %4291 = vmatprep.mubr.msk.bf16.mxu1 %vm454_vm1, %v5229_v27  ;;  %v1524_v54 = vrot.slane %v5186_v48, 1 }
 0x13a   : > { %4882 = vmatprep.subr.msk.bf16.mxu1 %vm503_vm0, %v3821_v47  ;;  %v1528_v47 = vrot.slane %v5180_v45, 1  ;;  %v1533_v45 = vrot.slane %v5223_v21, 1 }
 0x13c   : > { %v5560_v42 = vsel %vm1514_vm4, %v1533_v45, %v1534_v29  ;;  %v1560_v45 = vrot.slane %v5399_v20, 1  ;;  %v1561_v29 = vrot.slane %v5401_v30, 1  ;;  %v2225_v30 = vrot.slane %v5481_v57, 1 }
 0x13d   : > { %v2646_v57 = vsel %vm503_vm0, %v5523_v25, 0 }
 0x13e   : > { %4186 = vmatmul.mubr.msk.bf16.vlgmr.msra.gmra.mrb[32].mxu0 %vm454_vm1, %v5149_v7  ;;  %v1515_v7 = vrot.slane %v5099_v23, 1  ;;  %v5517_v23 = vsel %vm1514_vm4, %v1521_v51, %v1522_v50  ;;  %v5578_v50 = vsel %vm1514_vm4, %v1539_v24, %v1540_v13  ;;  %v3855_v13 = vld [vmem:[%s6046_s3 + $0x10] sm:$0x3] }
 0x13f   : > { %4189 = vmatprep.mubr.msk.bf16.mxu0 %vm454_vm1, %v5144_v3  ;;  %4218 = vmatpush3.bf16.msra.mxu0 %v1614_v56  ;;  %v1525_v56 = vrot.slane %v5188_v49, 1  ;;  %v1527_v49 = vrot.slane %v5178_v43, 1 }
 0x140   : > { %4292 = vmatmul.mubr.msk.bf16.gmra.mrb[4].mxu1 %vm454_vm1, %v5239_v32  ;;  %v1517_v18 = vsel %vm1514_vm4, %v1515_v7, %v1516_v8  ;;  %v1542_v7 = vrot.slane %v5303_v1, 1  ;;  %v1543_v8 = vrot.slane %v5305_v2, 1  ;;  %v1546_v2 = vrot.slane %v5297_v62, 1 }
 0x141   : > { %4295 = vmatprep.mubr.msk.bf16.mxu1 %vm454_vm1, %v5265_v11  ;;  %v5528_v5 = vsel %vm1514_vm4, %v1524_v54, %v1525_v56  ;;  %v5542_v61 = vsel %vm1514_vm4, %v1527_v49, %v1528_v47  ;;  %v1548_v54 = vrot.slane %v5339_v15, 1  ;;  %v1549_v56 = vrot.slane %v5341_v17, 1 }
 0x142   : > { %v5583_v51 = vsel %vm1514_vm4, %v1542_v7, %v1543_v8  ;;  %v1551_v62 = vrot.slane %v5331_v59, 1  ;;  %v1552_v17 = vrot.slane %v5333_v63, 1  ;;  %v1554_v49 = vrot.slane %v5375_v35, 1 }
 0x143   : > { %v1555_v47 = vrot.slane %v5377_v34, 1  ;;  %v1557_v63 = vrot.slane %v5367_v26, 1  ;;  %v1558_v34 = vrot.slane %v5369_v31, 1  ;;  %v2224_v31 = vrot.slane %v5408_v40, 1 }
 0x144   : > { %v5614_v36 = vsel %vm1514_vm4, %v1551_v62, %v1552_v17 }
 0x145   : > { %v5619_v58 = vsel %vm1514_vm4, %v1554_v49, %v1555_v47  ;;  %v5648_v24 = vsel %vm1514_vm4, %v2224_v31, %v2225_v30  ;;  %v3354_v47 = vld [vmem:[%s6050_s7] sm:$0x3] }
 0x146   : > { %4190 = vmatmul.mubr.msk.bf16.gmra.mrb[36].mxu0 %vm454_vm1, %v5186_v48 }
 0x147   : > { %4193 = vmatprep.mubr.msk.bf16.mxu0 %vm454_vm1, %v5178_v43 }
 0x148   : > { %4296 = vmatmul.mubr.msk.bf16.gmra.mrb[8].mxu1 %vm454_vm1, %v5275_v16 }
 0x149   : > { %4299 = vmatprep.mubr.msk.bf16.mxu1 %vm454_vm1, %v5301_v0 }
 0x14e   : > { %4194 = vmatmul.mubr.msk.bf16.gmra.mrb[40].mxu0 %vm454_vm1, %v5231_v28 }
 0x14f   : > { %4197 = vmatprep.mubr.msk.bf16.mxu0 %vm454_vm1, %v5223_v21 }
 0x150   : > { %4300 = vmatmul.mubr.msk.bf16.gmra.mrb[12].mxu1 %vm454_vm1, %v5311_v14 }
 0x151   : > { %4303 = vmatprep.mubr.msk.bf16.mxu1 %vm454_vm1, %v5337_v10 }
 0x156   : > { %4198 = vmatmul.mubr.msk.bf16.gmra.mrb[44].mxu0 %vm454_vm1, %v5267_v12 }
 0x157   : > { %4201 = vmatprep.mubr.msk.bf16.mxu0 %vm454_vm1, %v5259_v4 }
 0x158   : > { %4304 = vmatmul.mubr.msk.bf16.gmra.mrb[16].mxu1 %vm454_vm1, %v5347_v22 }
 0x159   : > { %4307 = vmatprep.mubr.msk.bf16.mxu1 %vm454_vm1, %v5373_v33 }
 0x15e   : > { %4202 = vmatmul.mubr.msk.bf16.gmra.mrb[48].mxu0 %vm454_vm1, %v5303_v1 }
 0x15f   : > { %4205 = vmatprep.mubr.msk.bf16.mxu0 %vm454_vm1, %v5295_v60 }
 0x160   : > { %4308 = vmatmul.mubr.msk.bf16.gmra.mrb[20].mxu1 %vm454_vm1, %v5382_v38 }
 0x161   : > { %4311 = vmatprep.mubr.msk.bf16.mxu1 %vm454_vm1, %v5397_v19 }
 0x166   : > { %4206 = vmatmul.mubr.msk.bf16.gmra.mrb[52].mxu0 %vm454_vm1, %v5339_v15 }
 0x167   : > { %4209 = vmatprep.mubr.msk.bf16.mxu0 %vm454_vm1, %v5331_v59 }
 0x168   : > { %4312 = vmatmul.mubr.msk.bf16.gmra.mrb[24].mxu1 %vm454_vm1, %v5406_v39 }
 0x169   : > { %4315 = vmatprep.mubr.msk.bf16.mxu1 %vm454_vm1, %v5422_v52 }
 0x16e   : > { %4210 = vmatmul.mubr.msk.bf16.gmra.mrb[56].mxu0 %vm454_vm1, %v5375_v35 }
 0x16f   : > { %4213 = vmatprep.mubr.msk.bf16.mxu0 %vm454_vm1, %v5367_v26 }
 0x170   : > { %4316 = vmatmul.mubr.msk.bf16.gmra.mrb[28].mxu1 %vm454_vm1, %v5500_v44 }
 0x171   : > { %4321 = vmatprep.mubr.msk.bf16.mxu1 %vm454_vm1, %v1520_v46 }
 0x176   : > { %4214 = vmatmul.mubr.msk.bf16.gmra.mrb[60].mxu0 %vm454_vm1, %v5399_v20 }
 0x177   : > { %4219 = vmatprep.mubr.msk.bf16.mxu0 %vm454_vm1, %v1517_v18  ;;  %v5596_v18 = vsel %vm1514_vm4, %v1545_v9, %v1546_v2 }
 0x178   : > { %4322 = vmatmul.mubr.msk.bf16.vlgmr.msra.gmra.mrb[0].mxu1 %vm454_vm1, %v5517_v23 }
 0x179   : > { %4354 = vmatpush3.bf16.msra.mxu1 %v2434_v55  ;;  %4325 = vmatprep.mubr.msk.bf16.mxu1 %vm454_vm1, %v5528_v5  ;;  %v5601_v55 = vsel %vm1514_vm4, %v1548_v54, %v1549_v56 }
 0x17a   : > { %4883 = vmatprep.subr.msk.bf16.mxu1 %vm503_vm0, %v5523_v25 }
 0x17e   : > { %4220 = vmatmul.mubr.msk.bf16.vlgmr.msra.gmra.mrb[32].mxu0 %vm454_vm1, %v1520_v46  ;;  %v5565_v46 = vsel %vm1514_vm4, %v1536_v37, %v1537_v41  ;;  %v5632_v37 = vsel %vm1514_vm4, %v1557_v63, %v1558_v34  ;;  %v5637_v41 = vsel %vm1514_vm4, %v1560_v45, %v1561_v29 }
 0x17f   : > { %4223 = vmatprep.mubr.msk.bf16.mxu0 %vm454_vm1, %v5517_v23 }
 0x180   : > { %4326 = vmatmul.mubr.msk.bf16.gmra.mrb[4].mxu1 %vm454_vm1, %v5542_v61 }
 0x181   : > { %4329 = vmatprep.mubr.msk.bf16.mxu1 %vm454_vm1, %v5547_v6 }
 0x186   : > { %4224 = vmatmul.mubr.msk.bf16.gmra.mrb[36].mxu0 %vm454_vm1, %v5528_v5 }
 0x187   : > { %4227 = vmatprep.mubr.msk.bf16.mxu0 %vm454_vm1, %v5542_v61 }
 0x188   : > { %4330 = vmatmul.mubr.msk.bf16.gmra.mrb[8].mxu1 %vm454_vm1, %v5560_v42 }
 0x189   : > { %4333 = vmatprep.mubr.msk.bf16.mxu1 %vm454_vm1, %v5565_v46 }
 0x18e   : > { %4228 = vmatmul.mubr.msk.bf16.gmra.mrb[40].mxu0 %vm454_vm1, %v5547_v6 }
 0x18f   : > { %4231 = vmatprep.mubr.msk.bf16.mxu0 %vm454_vm1, %v5560_v42 }
 0x190   : > { %4334 = vmatmul.mubr.msk.bf16.gmra.mrb[12].mxu1 %vm454_vm1, %v5578_v50 }
 0x191   : > { %4337 = vmatprep.mubr.msk.bf16.mxu1 %vm454_vm1, %v5583_v51 }
 0x196   : > { %4232 = vmatmul.mubr.msk.bf16.gmra.mrb[44].mxu0 %vm454_vm1, %v5565_v46 }
 0x197   : > { %4235 = vmatprep.mubr.msk.bf16.mxu0 %vm454_vm1, %v5578_v50 }
 0x198   : > { %4338 = vmatmul.mubr.msk.bf16.gmra.mrb[16].mxu1 %vm454_vm1, %v5596_v18 }
 0x199   : > { %4341 = vmatprep.mubr.msk.bf16.mxu1 %vm454_vm1, %v5601_v55 }
 0x19e   : > { %4236 = vmatmul.mubr.msk.bf16.gmra.mrb[48].mxu0 %vm454_vm1, %v5583_v51 }
 0x19f   : > { %4239 = vmatprep.mubr.msk.bf16.mxu0 %vm454_vm1, %v5596_v18 }
 0x1a0   : > { %4342 = vmatmul.mubr.msk.bf16.gmra.mrb[20].mxu1 %vm454_vm1, %v5614_v36 }
 0x1a1   : > { %4345 = vmatprep.mubr.msk.bf16.mxu1 %vm454_vm1, %v5619_v58 }
 0x1a6   : > { %4240 = vmatmul.mubr.msk.bf16.gmra.mrb[52].mxu0 %vm454_vm1, %v5601_v55 }
 0x1a7   : > { %4243 = vmatprep.mubr.msk.bf16.mxu0 %vm454_vm1, %v5614_v36 }
 0x1a8   : > { %4346 = vmatmul.mubr.msk.bf16.gmra.mrb[24].mxu1 %vm454_vm1, %v5632_v37 }
 0x1a9   : > { %4349 = vmatprep.mubr.msk.bf16.mxu1 %vm454_vm1, %v5637_v41 }
 0x1ae   : > { %4244 = vmatmul.mubr.msk.bf16.gmra.mrb[56].mxu0 %vm454_vm1, %v5619_v58 }
 0x1af   : > { %4247 = vmatprep.mubr.msk.bf16.mxu0 %vm454_vm1, %v5632_v37 }
 0x1b0   : > { %4350 = vmatmul.mubr.msk.bf16.gmra.mrb[28].mxu1 %vm454_vm1, %v5648_v24 }
 0x1b1   : > { %4355 = vmatprep.mubr.msk.bf16.mxu1 %vm454_vm1, %v5144_v3  ;;  %v839_v3 = vld [vmem:[#allocation2 + $0x198] sm:$0xff] }
 0x1b6   : > { %4248 = vmatmul.mubr.msk.bf16.gmra.mrb[60].mxu0 %vm454_vm1, %v5637_v41 }
 0x1b8   : > { %4356 = vmatmul.mubr.msk.bf16.vlgmr.msra.gmra.mrb[0].mxu1 %vm454_vm1, %v5186_v48 }
 0x1b9   : > { %4388 = vmatpush3.bf16.msra.mxu1 %v2646_v57  ;;  %4359 = vmatprep.mubr.msk.bf16.mxu1 %vm454_vm1, %v5178_v43  ;;  %v840_v43 = vld [vmem:[#allocation2 + $0x1a0] sm:$0xff] }
 0x1ba   : > { %4884 = vmatprep.subr.msk.bf16.mxu1 %vm503_vm0, %v3855_v13  ;;  %v5690_v48 = vpack.c.bf16 %v840_v43, %v839_v3 }
 0x1c0   : > { %4360 = vmatmul.mubr.msk.bf16.gmra.mrb[4].mxu1 %vm454_vm1, %v5231_v28  ;;  %v841_v28 = vld [vmem:[#allocation2 + $0x1a8] sm:$0x3] }
 0x1c1   : > { %4363 = vmatprep.mubr.msk.bf16.mxu1 %vm454_vm1, %v5223_v21  ;;  %v2852_v21 = vsel %vm503_vm0, %v3855_v13, 0 }
 0x1c8   : > { %4364 = vmatmul.mubr.msk.bf16.gmra.mrb[8].mxu1 %vm454_vm1, %v5267_v12 }
 0x1c9   : > { %4367 = vmatprep.mubr.msk.bf16.mxu1 %vm454_vm1, %v5259_v4  ;;  %v2631_v4 = vshll.u32 %v5690_v48, 16 }
 0x1cb   : > { %v2633_v12 = vrot.slane %v2631_v4, 1 }
 0x1d0   : > { %4368 = vmatmul.mubr.msk.bf16.gmra.mrb[12].mxu1 %vm454_vm1, %v5303_v1 }
 0x1d1   : > { %4371 = vmatprep.mubr.msk.bf16.mxu1 %vm454_vm1, %v5295_v60 }
 0x1d8   : > { %4372 = vmatmul.mubr.msk.bf16.gmra.mrb[16].mxu1 %vm454_vm1, %v5339_v15 }
 0x1d9   : > { %4375 = vmatprep.mubr.msk.bf16.mxu1 %vm454_vm1, %v5331_v59 }
 0x1e0   : > { %4376 = vmatmul.mubr.msk.bf16.gmra.mrb[20].mxu1 %vm454_vm1, %v5375_v35 }
 0x1e1   : > { %4379 = vmatprep.mubr.msk.bf16.mxu1 %vm454_vm1, %v5367_v26 }
 0x1e8   : > { %4380 = vmatmul.mubr.msk.bf16.gmra.mrb[24].mxu1 %vm454_vm1, %v5399_v20 }
 0x1e9   : > { %4383 = vmatprep.mubr.msk.bf16.mxu1 %vm454_vm1, %v5408_v40 }
 0x1f0   : > { %4384 = vmatmul.mubr.msk.bf16.gmra.mrb[28].mxu1 %vm454_vm1, %v5690_v48 }
 0x1f1   : > { %4389 = vmatprep.mubr.msk.bf16.mxu1 %vm454_vm1, %v5196_v53  ;;  %v3134_v53 = vld [vmem:[%s6048_s5] sm:$0x3] }
 0x1f2   : > { %4885 = vmatprep.subr.msk.bf16.mxu0 %vm503_vm0, %v3134_v53 }
 0x1f8   : > { %4390 = vmatmul.mubr.msk.bf16.vlgmr.msra.gmra.mrb[0].mxu1 %vm454_vm1, %v5229_v27  ;;  %v3191_v27 = vsel %vm503_vm0, %v3134_v53, 0 }
 0x1f9   : > { %4422 = vmatpush3.bf16.msra.mxu1 %v2852_v21  ;;  %4393 = vmatprep.mubr.msk.bf16.mxu1 %vm454_vm1, %v5239_v32  ;;  %v877_v32 = vpack.c.bf16 %v841_v28, %v841_v28 }
 0x1fa   : > { %4456 = vmatpush3.bf16.msra.mxu0 %v3191_v27 }
 0x1fb   : > { %4886 = vmatprep.subr.msk.bf16.mxu0 %vm503_vm0, %v3354_v47 }
 0x200   : > { %4394 = vmatmul.mubr.msk.bf16.gmra.mrb[4].mxu1 %vm454_vm1, %v5265_v11  ;;  %v2629_v11 = vshrl.u32 %v5690_v48, 16 }
 0x201   : > { %4397 = vmatprep.mubr.msk.bf16.mxu1 %vm454_vm1, %v5275_v16  ;;  %v2636_v16 = vshll.u32 %v877_v32, 16 }
 0x202   : > { %v2634_v60 = vor.u32 %v2633_v12, %v2629_v11 }
 0x208   : > { %4398 = vmatmul.mubr.msk.bf16.gmra.mrb[8].mxu1 %vm454_vm1, %v5301_v0  ;;  %v2638_v0 = vrot.slane %v2636_v16, 1 }
 0x209   : > { %4401 = vmatprep.mubr.msk.bf16.mxu1 %vm454_vm1, %v5311_v14 }
 0x20a   : > { %v2639_v1 = vsel %vm879_vm3, %v2634_v60, %v2638_v0 }
 0x210   : > { %4402 = vmatmul.mubr.msk.bf16.gmra.mrb[12].mxu1 %vm454_vm1, %v5337_v10 }
 0x211   : > { %4405 = vmatprep.mubr.msk.bf16.mxu1 %vm454_vm1, %v5347_v22 }
 0x218   : > { %4406 = vmatmul.mubr.msk.bf16.gmra.mrb[16].mxu1 %vm454_vm1, %v5373_v33 }
 0x219   : > { %4409 = vmatprep.mubr.msk.bf16.mxu1 %vm454_vm1, %v5382_v38 }
 0x220   : > { %4410 = vmatmul.mubr.msk.bf16.gmra.mrb[20].mxu1 %vm454_vm1, %v5397_v19 }
 0x221   : > { %4413 = vmatprep.mubr.msk.bf16.mxu1 %vm454_vm1, %v5406_v39 }
 0x228   : > { %4414 = vmatmul.mubr.msk.bf16.gmra.mrb[24].mxu1 %vm454_vm1, %v5422_v52  ;;  %v2843_v52 = vrot.slane %v5690_v48, 1 }
 0x229   : > { %4417 = vmatprep.mubr.msk.bf16.mxu1 %vm454_vm1, %v5500_v44  ;;  %v2844_v44 = vrot.slane %v877_v32, 1 }
 0x230   : > { %4418 = vmatmul.mubr.msk.bf16.gmra.mrb[28].mxu1 %vm454_vm1, %v2639_v1  ;;  %v3363_v1 = vsel %vm503_vm0, %v3354_v47, 0 }
 0x231   : > { %4423 = vmatprep.mubr.msk.bf16.mxu1 %vm454_vm1, %v5517_v23 }
 0x238   : > { %4424 = vmatmul.mubr.msk.bf16.vlgmr.msra.gmra.mrb[0].mxu1 %vm454_vm1, %v5528_v5 }
 0x239   : > { %4427 = vmatprep.mubr.msk.bf16.mxu1 %vm454_vm1, %v5542_v61  ;;  %v2845_v61 = vsel %vm1514_vm4, %v2843_v52, %v2844_v44 }
 0x240   : > { %4428 = vmatmul.mubr.msk.bf16.gmra.mrb[4].mxu1 %vm454_vm1, %v5547_v6 }
 0x241   : > { %4431 = vmatprep.mubr.msk.bf16.mxu1 %vm454_vm1, %v5560_v42 }
 0x248   : > { %4432 = vmatmul.mubr.msk.bf16.gmra.mrb[8].mxu1 %vm454_vm1, %v5565_v46 }
 0x249   : > { %4435 = vmatprep.mubr.msk.bf16.mxu1 %vm454_vm1, %v5578_v50 }
 0x250   : > { %4436 = vmatmul.mubr.msk.bf16.gmra.mrb[12].mxu1 %vm454_vm1, %v5583_v51 }
 0x251   : > { %v4221_v14 = vpop.f32.mrb[32].mxu0  ;;  %4439 = vmatprep.mubr.msk.bf16.mxu1 %vm454_vm1, %v5596_v18 }
 0x252   : > { %v1650_v59 = vpop.f32.mrb[33].mxu0 }
 0x253   : > { %v4222_v10 = vpop.f32.mrb[34].mxu0 }
 0x254   : > { %v1653_v15 = vpop.f32.mrb[35].mxu0 }
 0x258   : > { %4440 = vmatmul.mubr.msk.bf16.gmra.mrb[16].mxu1 %vm454_vm1, %v5601_v55 }
 0x259   : > { %v4225_v22 = vpop.f32.mrb[36].mxu0  ;;  %4443 = vmatprep.mubr.msk.bf16.mxu1 %vm454_vm1, %v5614_v36 }
 0x25a   : > { %v1666_v26 = vpop.f32.mrb[37].mxu0 }
 0x25b   : > { %v4226_v33 = vpop.f32.mrb[38].mxu0 }
 0x25c   : > { %v5756_v35 = vpop.f32.mrb[39].mxu0 }
 0x260   : > { %4444 = vmatmul.mubr.msk.bf16.gmra.mrb[20].mxu1 %vm454_vm1, %v5619_v58  ;;  %v5824_v58 = vld [vmem:[%s6047_s4] ss:$0 sm:$0xff] }
 0x261   : > { %v5760_v38 = vpop.f32.mrb[40].mxu0  ;;  %4447 = vmatprep.mubr.msk.bf16.mxu1 %vm454_vm1, %v5632_v37 }
 0x262   : > { %v5764_v19 = vpop.f32.mrb[41].mxu0 }
 0x263   : > { %v5766_v20 = vpop.f32.mrb[42].mxu0 }
 0x264   : > { %v5768_v39 = vpop.f32.mrb[43].mxu0 }
 0x268   : > { %4448 = vmatmul.mubr.msk.bf16.gmra.mrb[24].mxu1 %vm454_vm1, %v5637_v41 }
 0x269   : > { %v5772_v40 = vpop.f32.mrb[44].mxu0  ;;  %4451 = vmatprep.mubr.msk.bf16.mxu1 %vm454_vm1, %v5648_v24 }
 0x26a   : > { %v5777_v23 = vpop.f32.mrb[45].mxu0 }
 0x26b   : > { %v5779_v25 = vpop.f32.mrb[46].mxu0 }
 0x26c   : > { %v5781_v5 = vpop.f32.mrb[47].mxu0 }
 0x270   : > { %4452 = vmatmul.mubr.msk.bf16.gmra.mrb[28].mxu1 %vm454_vm1, %v2845_v61 }
 0x271   : > { %v5785_v6 = vpop.f32.mrb[48].mxu0 }
 0x272   : > { %v5787_v42 = vpop.f32.mrb[49].mxu0 }
 0x273   : > { %v5789_v46 = vpop.f32.mrb[50].mxu0 }
 0x274   : > { %v5791_v7 = vpop.f32.mrb[51].mxu0 }
 0x279   : > { %v5793_v8 = vpop.f32.mrb[52].mxu0 }
 0x27a   : > { %v5795_v50 = vpop.f32.mrb[53].mxu0 }
 0x27b   : > { %v5797_v51 = vpop.f32.mrb[54].mxu0 }
 0x27c   : > { %v5799_v9 = vpop.f32.mrb[55].mxu0 }
 0x281   : > { %v5801_v2 = vpop.f32.mrb[56].mxu0 }
 0x282   : > { %v5803_v54 = vpop.f32.mrb[57].mxu0 }
 0x283   : > { %v5805_v56 = vpop.f32.mrb[58].mxu0 }
 0x284   : > { %v5807_v18 = vpop.f32.mrb[59].mxu0 }
 0x289   : > { %v5809_v55 = vpop.f32.mrb[60].mxu0 }
 0x28a   : > { %v5811_v62 = vpop.f32.mrb[61].mxu0 }
 0x28b   : > { %v5813_v17 = vpop.f32.mrb[62].mxu0 }
 0x28c   : > { %v5815_v49 = vpop.f32.mrb[63].mxu0 }
 0x30b   : > { %v4425_v36 = vpop.f32.mrb[0].mxu1 }
 0x30c   : > { %v4523_v63 = vadd.f32 %v4425_v36, %v4221_v14  ;;  %v2888_v34 = vpop.f32.mrb[1].mxu1 }
 0x30d   : > { %v4524_v45 = vadd.f32 %v2888_v34, %v1650_v59  ;;  %v4426_v29 = vpop.f32.mrb[2].mxu1 }
 0x30e   : > { %v3056_v37 = vadd.f32 %v4523_v63, %v5824_v58  ;;  %v4525_v41 = vadd.f32 %v4426_v29, %v4222_v10  ;;  %v2891_v31 = vpop.f32.mrb[3].mxu1 }
 0x30f   : > { %v3054_v30 = vadd.f32 %v4524_v45, %v5824_v58  ;;  %v4526_v24 = vadd.f32 %v2891_v31, %v1653_v15 }
 0x310   : > { %v3057_v57 = vadd.f32 %v4525_v41, %v5824_v58  ;;  %v3088_v3 = vmax.f32 %v3056_v37, 0.0 }
 0x311   : > { %v3055_v13 = vadd.f32 %v4526_v24, %v5824_v58  ;;  %v3086_v48 = vmax.f32 %v3054_v30, 0.0 }
 0x312   : > { %v3089_v43 = vmax.f32 %v3057_v57, 0.0 }
 0x313   : > { %v3087_v21 = vmax.f32 %v3055_v13, 0.0  ;;  %v4429_v53 = vpop.f32.mrb[4].mxu1 }
 0x314   : > { %v3119_v27 = vpack.c.bf16 %v3089_v43, %v3088_v3  ;;  %v4527_v28 = vadd.f32 %v4429_v53, %v4225_v22  ;;  %v2904_v32 = vpop.f32.mrb[5].mxu1 }
 0x315   : > { %v3118_v4 = vpack.c.bf16 %v3087_v21, %v3086_v48  ;;  %v4528_v11 = vadd.f32 %v2904_v32, %v1666_v26  ;;  %v4430_v12 = vpop.f32.mrb[6].mxu1 }
 0x316   : > { %v3060_v16 = vadd.f32 %v4527_v28, %v5824_v58  ;;  %v4529_v60 = vadd.f32 %v4430_v12, %v4226_v33  ;;  %v2907_v0 = vpop.f32.mrb[7].mxu1 }
 0x317   : > { %v3058_v14 = vadd.f32 %v4528_v11, %v5824_v58  ;;  %v4530_v59 = vadd.f32 %v2907_v0, %v5756_v35  ;;  %4457 = vmatprep.mubr.msk.bf16.mxu0 %vm454_vm1, %v3118_v4 }
 0x318   : > { %v3061_v10 = vadd.f32 %v4529_v60, %v5824_v58  ;;  %4458 = vmatmul.mubr.msk.bf16.vlgmr.msra.gmra.mrb[64].mxu0 %vm454_vm1, %v3119_v27  ;;  %v3092_v22 = vmax.f32 %v3060_v16, 0.0 }
 0x319   : > { %v3059_v15 = vadd.f32 %v4530_v59, %v5824_v58  ;;  %4490 = vmatpush3.bf16.msra.mxu0 %v3363_v1  ;;  %v3090_v52 = vmax.f32 %v3058_v14, 0.0 }
 0x31a   : > { %v3093_v26 = vmax.f32 %v3061_v10, 0.0 }
 0x31b   : > { %v3091_v33 = vmax.f32 %v3059_v15, 0.0  ;;  %v4433_v44 = vpop.f32.mrb[8].mxu1 }
 0x31c   : > { %v3121_v61 = vpack.c.bf16 %v3093_v26, %v3092_v22  ;;  %v4531_v47 = vadd.f32 %v4433_v44, %v5760_v38  ;;  %v2920_v36 = vpop.f32.mrb[9].mxu1 }
 0x31d   : > { %v3120_v63 = vpack.c.bf16 %v3091_v33, %v3090_v52  ;;  %v4532_v35 = vadd.f32 %v2920_v36, %v5764_v19  ;;  %v4434_v34 = vpop.f32.mrb[10].mxu1 }
 0x31e   : > { %v3064_v45 = vadd.f32 %v4531_v47, %v5824_v58  ;;  %v4533_v29 = vadd.f32 %v4434_v34, %v5766_v20  ;;  %v2923_v37 = vpop.f32.mrb[11].mxu1 }
 0x31f   : > { %v3062_v41 = vadd.f32 %v4532_v35, %v5824_v58  ;;  %v4534_v31 = vadd.f32 %v2923_v37, %v5768_v39  ;;  %4461 = vmatprep.mubr.msk.bf16.mxu0 %vm454_vm1, %v3120_v63 }
 0x320   : > { %v3065_v30 = vadd.f32 %v4533_v29, %v5824_v58  ;;  %4462 = vmatmul.mubr.msk.bf16.gmra.mrb[68].mxu0 %vm454_vm1, %v3121_v61  ;;  %v3096_v24 = vmax.f32 %v3064_v45, 0.0 }
 0x321   : > { %v3063_v38 = vadd.f32 %v4534_v31, %v5824_v58  ;;  %v3094_v57 = vmax.f32 %v3062_v41, 0.0 }
 0x322   : > { %v3097_v19 = vmax.f32 %v3065_v30, 0.0 }
 0x323   : > { %v3095_v13 = vmax.f32 %v3063_v38, 0.0  ;;  %v4437_v3 = vpop.f32.mrb[12].mxu1 }
 0x324   : > { %v3123_v43 = vpack.c.bf16 %v3097_v19, %v3096_v24  ;;  %v4535_v20 = vadd.f32 %v4437_v3, %v5772_v40  ;;  %v2936_v48 = vpop.f32.mrb[13].mxu1 }
 0x325   : > { %v3122_v21 = vpack.c.bf16 %v3095_v13, %v3094_v57  ;;  %v4536_v39 = vadd.f32 %v2936_v48, %v5777_v23  ;;  %v4438_v53 = vpop.f32.mrb[14].mxu1 }
 0x326   : > { %v3068_v27 = vadd.f32 %v4535_v20, %v5824_v58  ;;  %v4537_v28 = vadd.f32 %v4438_v53, %v5779_v25  ;;  %v2939_v32 = vpop.f32.mrb[15].mxu1 }
 0x327   : > { %v3066_v4 = vadd.f32 %v4536_v39, %v5824_v58  ;;  %v4538_v11 = vadd.f32 %v2939_v32, %v5781_v5  ;;  %4465 = vmatprep.mubr.msk.bf16.mxu0 %vm454_vm1, %v3122_v21 }
 0x328   : > { %v3069_v12 = vadd.f32 %v4537_v28, %v5824_v58  ;;  %4466 = vmatmul.mubr.msk.bf16.gmra.mrb[72].mxu0 %vm454_vm1, %v3123_v43  ;;  %v3100_v16 = vmax.f32 %v3068_v27, 0.0 }
 0x329   : > { %v3067_v40 = vadd.f32 %v4538_v11, %v5824_v58  ;;  %v3098_v60 = vmax.f32 %v3066_v4, 0.0 }
 0x32a   : > { %v3101_v23 = vmax.f32 %v3069_v12, 0.0 }
 0x32b   : > { %v3099_v0 = vmax.f32 %v3067_v40, 0.0  ;;  %v4441_v1 = vpop.f32.mrb[16].mxu1 }
 0x32c   : > { %v3125_v14 = vpack.c.bf16 %v3101_v23, %v3100_v16  ;;  %v4539_v25 = vadd.f32 %v4441_v1, %v5785_v6  ;;  %v2952_v59 = vpop.f32.mrb[17].mxu1 }
 0x32d   : > { %v3124_v10 = vpack.c.bf16 %v3099_v0, %v3098_v60  ;;  %v4540_v5 = vadd.f32 %v2952_v59, %v5787_v42  ;;  %v4442_v15 = vpop.f32.mrb[18].mxu1 }
 0x32e   : > { %v3072_v22 = vadd.f32 %v4539_v25, %v5824_v58  ;;  %v4541_v26 = vadd.f32 %v4442_v15, %v5789_v46  ;;  %v2955_v52 = vpop.f32.mrb[19].mxu1 }
 0x32f   : > { %v3070_v33 = vadd.f32 %v4540_v5, %v5824_v58  ;;  %v4542_v44 = vadd.f32 %v2955_v52, %v5791_v7  ;;  %4469 = vmatprep.mubr.msk.bf16.mxu0 %vm454_vm1, %v3124_v10 }
 0x330   : > { %v3073_v61 = vadd.f32 %v4541_v26, %v5824_v58  ;;  %4470 = vmatmul.mubr.msk.bf16.gmra.mrb[76].mxu0 %vm454_vm1, %v3125_v14  ;;  %v3104_v47 = vmax.f32 %v3072_v22, 0.0 }
 0x331   : > { %v3071_v6 = vadd.f32 %v4542_v44, %v5824_v58  ;;  %v3102_v36 = vmax.f32 %v3070_v33, 0.0 }
 0x332   : > { %v3105_v42 = vmax.f32 %v3073_v61, 0.0  ;;  %v4913_v61 = vld [vmem:[%s5006_s16 + $0x8] sm:$0xff]  }
 0x333   : > { %v3103_v63 = vmax.f32 %v3071_v6, 0.0  ;;  %v4445_v35 = vpop.f32.mrb[20].mxu1  ;;  %v4915_v6 = vld [vmem:[%s5006_s16 + $0x18] sm:$0xff]  }
 0x334   : > { %v3127_v34 = vpack.c.bf16 %v3105_v42, %v3104_v47  ;;  %v4543_v46 = vadd.f32 %v4445_v35, %v5793_v8  ;;  %v2968_v45 = vpop.f32.mrb[21].mxu1  ;;  %v4916_v47 = vld [vmem:[%s5006_s16 + $0x20] sm:$0xff]   ;;  %v4917_v42 = vld [vmem:[%s5006_s16 + $0x28] sm:$0xff]  }
 0x335   : > { %v3126_v29 = vpack.c.bf16 %v3103_v63, %v3102_v36  ;;  %v4544_v7 = vadd.f32 %v2968_v45, %v5795_v50  ;;  %v4446_v37 = vpop.f32.mrb[22].mxu1  ;;  %v4918_v36 = vld [vmem:[%s5006_s16 + $0x30] sm:$0xff]   ;;  %v4919_v63 = vld [vmem:[%s5006_s16 + $0x38] sm:$0xff]   ;;  %v4920_v35 = vld [vmem:[%s5006_s16 + $0x40] sm:$0xff]  }
 0x336   : > { %v3076_v41 = vadd.f32 %v4543_v46, %v5824_v58  ;;  %v4545_v31 = vadd.f32 %v4446_v37, %v5797_v51  ;;  %v2971_v30 = vpop.f32.mrb[23].mxu1  ;;  %v4922_v46 = vld [vmem:[%s5006_s16 + $0x50] sm:$0xff]   ;;  %v4923_v45 = vld [vmem:[%s5006_s16 + $0x58] sm:$0xff]  }
 0x337   : > { %v3074_v38 = vadd.f32 %v4544_v7, %v5824_v58  ;;  %v4546_v24 = vadd.f32 %v2971_v30, %v5799_v9  ;;  %4473 = vmatprep.mubr.msk.bf16.mxu0 %vm454_vm1, %v3126_v29  ;;  %v4924_v29 = vld [vmem:[%s5006_s16 + $0x60] sm:$0xff]   ;;  %v4925_v7 = vld [vmem:[%s5006_s16 + $0x68] sm:$0xff]   ;;  %v4926_v37 = vld [vmem:[%s5006_s16 + $0x70] sm:$0xff]  }
 0x338   : > { %v3077_v19 = vadd.f32 %v4545_v31, %v5824_v58  ;;  %4474 = vmatmul.mubr.msk.bf16.gmra.mrb[80].mxu0 %vm454_vm1, %v3127_v34  ;;  %v3108_v57 = vmax.f32 %v3076_v41, 0.0  ;;  %v4921_v34 = vld [vmem:[%s5006_s16 + $0x48] sm:$0xff]   ;;  %v4927_v41 = vld [vmem:[%s5006_s16 + $0x78] sm:$0xff]   ;;  %v3873_v31 = vld [vmem:[%s6049_s6] ss:$0 sm:$0xff] }
 0x339   : > { %v3075_v8 = vadd.f32 %v4546_v24, %v5824_v58  ;;  %v3106_v13 = vmax.f32 %v3074_v38, 0.0  ;;  %v3890_v30 = vld [vmem:[%s6051_s8] ss:$0 sm:$0xff] }
 0x33a   : > { %v3109_v50 = vmax.f32 %v3077_v19, 0.0  ;;  %v5938_v38 = vadd.f32 %v3890_v30, %v3873_v31 }
 0x33b   : > { %v3107_v3 = vmax.f32 %v3075_v8, 0.0  ;;  %v4449_v43 = vpop.f32.mrb[24].mxu1 }
 0x33c   : > { %v3129_v20 = vpack.c.bf16 %v3109_v50, %v3108_v57  ;;  %v4547_v51 = vadd.f32 %v4449_v43, %v5801_v2  ;;  %v2984_v48 = vpop.f32.mrb[25].mxu1 }
 0x33d   : > { %v3128_v21 = vpack.c.bf16 %v3107_v3, %v3106_v13  ;;  %v4548_v9 = vadd.f32 %v2984_v48, %v5803_v54  ;;  %v4450_v39 = vpop.f32.mrb[26].mxu1 }
 0x33e   : > { %v3080_v53 = vadd.f32 %v4547_v51, %v5824_v58  ;;  %v4549_v27 = vadd.f32 %v4450_v39, %v5805_v56  ;;  %v2987_v28 = vpop.f32.mrb[27].mxu1 }
 0x33f   : > { %v3078_v32 = vadd.f32 %v4548_v9, %v5824_v58  ;;  %v4550_v4 = vadd.f32 %v2987_v28, %v5807_v18  ;;  %4477 = vmatprep.mubr.msk.bf16.mxu0 %vm454_vm1, %v3128_v21 }
 0x340   : > { %v3081_v11 = vadd.f32 %v4549_v27, %v5824_v58  ;;  %4478 = vmatmul.mubr.msk.bf16.gmra.mrb[84].mxu0 %vm454_vm1, %v3129_v20  ;;  %v3112_v12 = vmax.f32 %v3080_v53, 0.0 }
 0x341   : > { %v3079_v2 = vadd.f32 %v4550_v4, %v5824_v58  ;;  %v3110_v40 = vmax.f32 %v3078_v32, 0.0 }
 0x342   : > { %v3113_v54 = vmax.f32 %v3081_v11, 0.0 }
 0x343   : > { %v3111_v16 = vmax.f32 %v3079_v2, 0.0  ;;  %v4453_v23 = vpop.f32.mrb[28].mxu1 }
 0x344   : > { %v3131_v60 = vpack.c.bf16 %v3113_v54, %v3112_v12  ;;  %v4551_v56 = vadd.f32 %v4453_v23, %v5809_v55  ;;  %v3000_v0 = vpop.f32.mrb[29].mxu1 }
 0x345   : > { %v3130_v1 = vpack.c.bf16 %v3111_v16, %v3110_v40  ;;  %v4552_v18 = vadd.f32 %v3000_v0, %v5811_v62  ;;  %v4454_v14 = vpop.f32.mrb[30].mxu1 }
 0x346   : > { %v3084_v25 = vadd.f32 %v4551_v56, %v5824_v58  ;;  %v4553_v59 = vadd.f32 %v4454_v14, %v5813_v17  ;;  %v3003_v10 = vpop.f32.mrb[31].mxu1 }
 0x347   : > { %v3082_v5 = vadd.f32 %v4552_v18, %v5824_v58  ;;  %v4554_v15 = vadd.f32 %v3003_v10, %v5815_v49  ;;  %4481 = vmatprep.mubr.msk.bf16.mxu0 %vm454_vm1, %v3130_v1  ;;  %v4912_v49 = vld [vmem:[%s5006_s16] sm:$0xff]  }
 0x348   : > { %v3085_v55 = vadd.f32 %v4553_v59, %v5824_v58  ;;  %4482 = vmatmul.mubr.msk.bf16.gmra.mrb[88].mxu0 %vm454_vm1, %v3131_v60  ;;  %v3116_v22 = vmax.f32 %v3084_v25, 0.0 }
 0x349   : > { %v3083_v62 = vadd.f32 %v4554_v15, %v5824_v58  ;;  %v3114_v26 = vmax.f32 %v3082_v5, 0.0  ;;  %v4914_v58 = vld [vmem:[%s5006_s16 + $0x10] sm:$0xff]  }
 0x34a   : > { %v3117_v17 = vmax.f32 %v3085_v55, 0.0 }
 0x34b   : > { %v3115_v52 = vmax.f32 %v3083_v62, 0.0 }
 0x34c   : > { %v3133_v33 = vpack.c.bf16 %v3117_v17, %v3116_v22 }
 0x34d   : > { %v3132_v44 = vpack.c.bf16 %v3115_v52, %v3114_v26 }
 0x34f   : > { %4485 = vmatprep.mubr.msk.bf16.mxu0 %vm454_vm1, %v3132_v44 }
 0x350   : > { %4486 = vmatmul.mubr.msk.bf16.gmra.mrb[92].mxu0 %vm454_vm1, %v3133_v33 }
 0x351   : > { %4491 = vmatprep.mubr.msk.bf16.mxu0 %vm454_vm1, %v4912_v49 }
 0x358   : > { %4492 = vmatmul.mubr.msk.bf16.vlgmr.msra.gmra.mrb[64].mxu0 %vm454_vm1, %v4913_v61 }
 0x359   : > { %4495 = vmatprep.mubr.msk.bf16.mxu0 %vm454_vm1, %v4914_v58 }
 0x360   : > { %4496 = vmatmul.mubr.msk.bf16.gmra.mrb[68].mxu0 %vm454_vm1, %v4915_v6 }
 0x361   : > { %4499 = vmatprep.mubr.msk.bf16.mxu0 %vm454_vm1, %v4916_v47 }
 0x368   : > { %4500 = vmatmul.mubr.msk.bf16.gmra.mrb[72].mxu0 %vm454_vm1, %v4917_v42 }
 0x369   : > { %4503 = vmatprep.mubr.msk.bf16.mxu0 %vm454_vm1, %v4918_v36 }
 0x370   : > { %4504 = vmatmul.mubr.msk.bf16.gmra.mrb[76].mxu0 %vm454_vm1, %v4919_v63 }
 0x371   : > { %4507 = vmatprep.mubr.msk.bf16.mxu0 %vm454_vm1, %v4920_v35 }
 0x378   : > { %4508 = vmatmul.mubr.msk.bf16.gmra.mrb[80].mxu0 %vm454_vm1, %v4921_v34 }
 0x379   : > { %4511 = vmatprep.mubr.msk.bf16.mxu0 %vm454_vm1, %v4922_v46 }
 0x380   : > { %4512 = vmatmul.mubr.msk.bf16.gmra.mrb[84].mxu0 %vm454_vm1, %v4923_v45 }
 0x381   : > { %4515 = vmatprep.mubr.msk.bf16.mxu0 %vm454_vm1, %v4924_v29 }
 0x388   : > { %4516 = vmatmul.mubr.msk.bf16.gmra.mrb[88].mxu0 %vm454_vm1, %v4925_v7 }
 0x389   : > { %4519 = vmatprep.mubr.msk.bf16.mxu0 %vm454_vm1, %v4926_v37 }
 0x390   : > { %4520 = vmatmul.mubr.msk.bf16.gmra.mrb[92].mxu0 %vm454_vm1, %v4927_v41 }
 0x42b   : > { %v4493_v24 = vpop.f32.mrb[64].mxu0 }
 0x42c   : > { %v4555_v19 = vadd.f32 %v4493_v24, %v3873_v31  ;;  %v3399_v8 = vpop.f32.mrb[65].mxu0 }
 0x42d   : > { %v4557_v57 = vadd.f32 %v3873_v31, %v3399_v8  ;;  %v4494_v50 = vpop.f32.mrb[66].mxu0 }
 0x42e   : > { %v4556_v13 = vadd.f32 %v4555_v19, %v3890_v30  ;;  %v4560_v3 = vadd.f32 %v5938_v38, %v4494_v50  ;;  %v3402_v43 = vpop.f32.mrb[67].mxu0 }
 0x42f   : > { %v4558_v20 = vadd.f32 %v4557_v57, %v3890_v30  ;;  %v4562_v51 = vadd.f32 %v5938_v38, %v3402_v43 }
 0x430   : > { %v3560_v48 = vmax.f32 %v4556_v13, 0.0  ;;  %v3561_v21 = vmax.f32 %v4560_v3, 0.0 }
 0x431   : > { %v3558_v9 = vmax.f32 %v4558_v20, 0.0  ;;  %v3559_v39 = vmax.f32 %v4562_v51, 0.0 }
 0x432   : > { %3593 = vst.msk [vmem:[%s5945_s12 + $0x10] sm:$0xff] %vm3590_vm5, %v3560_v48  ;;  %3594 = vst.msk [vmem:[%s5945_s12 + $0x18] sm:$0xff] %vm3590_vm5, %v3561_v21 }
 0x433   : > { %3591 = vst.msk [vmem:[%s5945_s12] sm:$0xff] %vm3590_vm5, %v3558_v9  ;;  %3592 = vst.msk [vmem:[%s5945_s12 + $0x8] sm:$0xff] %vm3590_vm5, %v3559_v39  ;;  %v4497_v53 = vpop.f32.mrb[68].mxu0 }
 0x434   : > { %v4564_v27 = vadd.f32 %v5938_v38, %v4497_v53  ;;  %v3415_v28 = vpop.f32.mrb[69].mxu0 }
 0x435   : > { %v4566_v32 = vadd.f32 %v5938_v38, %v3415_v28  ;;  %v4498_v4 = vpop.f32.mrb[70].mxu0 }
 0x436   : > { %v3564_v11 = vmax.f32 %v4564_v27, 0.0  ;;  %v4568_v2 = vadd.f32 %v5938_v38, %v4498_v4  ;;  %v3418_v12 = vpop.f32.mrb[71].mxu0 }
 0x437   : > { %v3562_v54 = vmax.f32 %v4566_v32, 0.0  ;;  %v4570_v40 = vadd.f32 %v5938_v38, %v3418_v12 }
 0x438   : > { %3597 = vst.msk [vmem:[%s5945_s12 + $0x30] sm:$0xff] %vm3590_vm5, %v3564_v11  ;;  %v3565_v16 = vmax.f32 %v4568_v2, 0.0 }
 0x439   : > { %3595 = vst.msk [vmem:[%s5945_s12 + $0x20] sm:$0xff] %vm3590_vm5, %v3562_v54  ;;  %v3563_v23 = vmax.f32 %v4570_v40, 0.0 }
 0x43a   : > { %3598 = vst.msk [vmem:[%s5945_s12 + $0x38] sm:$0xff] %vm3590_vm5, %v3565_v16 }
 0x43b   : > { %3596 = vst.msk [vmem:[%s5945_s12 + $0x28] sm:$0xff] %vm3590_vm5, %v3563_v23  ;;  %v4501_v60 = vpop.f32.mrb[72].mxu0 }
 0x43c   : > { %v4572_v56 = vadd.f32 %v5938_v38, %v4501_v60  ;;  %v3431_v0 = vpop.f32.mrb[73].mxu0 }
 0x43d   : > { %v4574_v1 = vadd.f32 %v5938_v38, %v3431_v0  ;;  %v4502_v18 = vpop.f32.mrb[74].mxu0 }
 0x43e   : > { %v3568_v14 = vmax.f32 %v4572_v56, 0.0  ;;  %v4576_v25 = vadd.f32 %v5938_v38, %v4502_v18  ;;  %v3434_v59 = vpop.f32.mrb[75].mxu0 }
 0x43f   : > { %v3566_v10 = vmax.f32 %v4574_v1, 0.0  ;;  %v4578_v5 = vadd.f32 %v5938_v38, %v3434_v59 }
 0x440   : > { %3601 = vst.msk [vmem:[%s5945_s12 + $0x50] sm:$0xff] %vm3590_vm5, %v3568_v14  ;;  %v3569_v15 = vmax.f32 %v4576_v25, 0.0 }
 0x441   : > { %3599 = vst.msk [vmem:[%s5945_s12 + $0x40] sm:$0xff] %vm3590_vm5, %v3566_v10  ;;  %v3567_v55 = vmax.f32 %v4578_v5, 0.0 }
 0x442   : > { %3602 = vst.msk [vmem:[%s5945_s12 + $0x58] sm:$0xff] %vm3590_vm5, %v3569_v15 }
 0x443   : > { %3600 = vst.msk [vmem:[%s5945_s12 + $0x48] sm:$0xff] %vm3590_vm5, %v3567_v55  ;;  %v4505_v62 = vpop.f32.mrb[76].mxu0 }
 0x444   : > { %v4580_v22 = vadd.f32 %v5938_v38, %v4505_v62  ;;  %v3447_v17 = vpop.f32.mrb[77].mxu0 }
 0x445   : > { %v4582_v26 = vadd.f32 %v5938_v38, %v3447_v17  ;;  %v4506_v52 = vpop.f32.mrb[78].mxu0 }
 0x446   : > { %v3572_v33 = vmax.f32 %v4580_v22, 0.0  ;;  %v4584_v44 = vadd.f32 %v5938_v38, %v4506_v52  ;;  %v3450_v49 = vpop.f32.mrb[79].mxu0 }
 0x447   : > { %v3570_v61 = vmax.f32 %v4582_v26, 0.0  ;;  %v4586_v58 = vadd.f32 %v5938_v38, %v3450_v49 }
 0x448   : > { %3605 = vst.msk [vmem:[%s5945_s12 + $0x70] sm:$0xff] %vm3590_vm5, %v3572_v33  ;;  %v3573_v6 = vmax.f32 %v4584_v44, 0.0 }
 0x449   : > { %3603 = vst.msk [vmem:[%s5945_s12 + $0x60] sm:$0xff] %vm3590_vm5, %v3570_v61  ;;  %v3571_v47 = vmax.f32 %v4586_v58, 0.0 }
 0x44a   : > { %3606 = vst.msk [vmem:[%s5945_s12 + $0x78] sm:$0xff] %vm3590_vm5, %v3573_v6 }
 0x44b   : > { %3604 = vst.msk [vmem:[%s5945_s12 + $0x68] sm:$0xff] %vm3590_vm5, %v3571_v47  ;;  %v4509_v42 = vpop.f32.mrb[80].mxu0 }
 0x44c   : > { %v4588_v36 = vadd.f32 %v5938_v38, %v4509_v42  ;;  %v3463_v63 = vpop.f32.mrb[81].mxu0 }
 0x44d   : > { %v4590_v35 = vadd.f32 %v5938_v38, %v3463_v63  ;;  %v4510_v34 = vpop.f32.mrb[82].mxu0 }
 0x44e   : > { %v3576_v46 = vmax.f32 %v4588_v36, 0.0  ;;  %v4592_v45 = vadd.f32 %v5938_v38, %v4510_v34  ;;  %v3466_v29 = vpop.f32.mrb[83].mxu0 }
 0x44f   : > { %v3574_v7 = vmax.f32 %v4590_v35, 0.0  ;;  %v4594_v37 = vadd.f32 %v5938_v38, %v3466_v29 }
 0x450   : > { %3609 = vst.msk [vmem:[%s5945_s12 + $0x90] sm:$0xff] %vm3590_vm5, %v3576_v46  ;;  %v3577_v41 = vmax.f32 %v4592_v45, 0.0 }
 0x451   : > { %3607 = vst.msk [vmem:[%s5945_s12 + $0x80] sm:$0xff] %vm3590_vm5, %v3574_v7  ;;  %v3575_v31 = vmax.f32 %v4594_v37, 0.0 }
 0x452   : > { %3610 = vst.msk [vmem:[%s5945_s12 + $0x98] sm:$0xff] %vm3590_vm5, %v3577_v41 }
 0x453   : > { %3608 = vst.msk [vmem:[%s5945_s12 + $0x88] sm:$0xff] %vm3590_vm5, %v3575_v31  ;;  %v4513_v30 = vpop.f32.mrb[84].mxu0 }
 0x454   : > { %v4596_v24 = vadd.f32 %v5938_v38, %v4513_v30  ;;  %v3479_v19 = vpop.f32.mrb[85].mxu0 }
 0x455   : > { %v4598_v8 = vadd.f32 %v5938_v38, %v3479_v19  ;;  %v4514_v57 = vpop.f32.mrb[86].mxu0 }
 0x456   : > { %v3580_v50 = vmax.f32 %v4596_v24, 0.0  ;;  %v4600_v13 = vadd.f32 %v5938_v38, %v4514_v57  ;;  %v3482_v3 = vpop.f32.mrb[87].mxu0 }
 0x457   : > { %v3578_v43 = vmax.f32 %v4598_v8, 0.0  ;;  %v4602_v20 = vadd.f32 %v5938_v38, %v3482_v3 }
 0x458   : > { %3613 = vst.msk [vmem:[%s5945_s12 + $0xb0] sm:$0xff] %vm3590_vm5, %v3580_v50  ;;  %v3581_v51 = vmax.f32 %v4600_v13, 0.0 }
 0x459   : > { %3611 = vst.msk [vmem:[%s5945_s12 + $0xa0] sm:$0xff] %vm3590_vm5, %v3578_v43  ;;  %v3579_v48 = vmax.f32 %v4602_v20, 0.0 }
 0x45a   : > { %3614 = vst.msk [vmem:[%s5945_s12 + $0xb8] sm:$0xff] %vm3590_vm5, %v3581_v51 }
 0x45b   : > { %3612 = vst.msk [vmem:[%s5945_s12 + $0xa8] sm:$0xff] %vm3590_vm5, %v3579_v48  ;;  %v4517_v21 = vpop.f32.mrb[88].mxu0 }
 0x45c   : > { %v4604_v9 = vadd.f32 %v5938_v38, %v4517_v21  ;;  %v3495_v39 = vpop.f32.mrb[89].mxu0 }
 0x45d   : > { %v4606_v53 = vadd.f32 %v5938_v38, %v3495_v39  ;;  %v4518_v27 = vpop.f32.mrb[90].mxu0 }
 0x45e   : > { %v3584_v28 = vmax.f32 %v4604_v9, 0.0  ;;  %v4608_v32 = vadd.f32 %v5938_v38, %v4518_v27  ;;  %v3498_v4 = vpop.f32.mrb[91].mxu0 }
 0x45f   : > { %v3582_v11 = vmax.f32 %v4606_v53, 0.0  ;;  %v4610_v2 = vadd.f32 %v5938_v38, %v3498_v4 }
 0x460   : > { %3617 = vst.msk [vmem:[%s5945_s12 + $0xd0] sm:$0xff] %vm3590_vm5, %v3584_v28  ;;  %v3585_v12 = vmax.f32 %v4608_v32, 0.0 }
 0x461   : > { %3615 = vst.msk [vmem:[%s5945_s12 + $0xc0] sm:$0xff] %vm3590_vm5, %v3582_v11  ;;  %v3583_v54 = vmax.f32 %v4610_v2, 0.0 }
 0x462   : > { %3618 = vst.msk [vmem:[%s5945_s12 + $0xd8] sm:$0xff] %vm3590_vm5, %v3585_v12 }
 0x463   : > { %3616 = vst.msk [vmem:[%s5945_s12 + $0xc8] sm:$0xff] %vm3590_vm5, %v3583_v54  ;;  %v4521_v40 = vpop.f32.mrb[92].mxu0 }
 0x464   : > { %v4612_v16 = vadd.f32 %v5938_v38, %v4521_v40  ;;  %v3511_v23 = vpop.f32.mrb[93].mxu0 }
 0x465   : > { %v4614_v60 = vadd.f32 %v5938_v38, %v3511_v23  ;;  %v4522_v56 = vpop.f32.mrb[94].mxu0 }
 0x466   : > { %v3588_v0 = vmax.f32 %v4612_v16, 0.0  ;;  %v4616_v1 = vadd.f32 %v5938_v38, %v4522_v56  ;;  %v3514_v18 = vpop.f32.mrb[95].mxu0 }
 0x467   : > { %v3586_v14 = vmax.f32 %v4614_v60, 0.0  ;;  %v4618_v25 = vadd.f32 %v5938_v38, %v3514_v18 }
 0x468   : > { %3621 = vst.msk [vmem:[%s5945_s12 + $0xf0] sm:$0xff] %vm3590_vm5, %v3588_v0  ;;  %v3589_v59 = vmax.f32 %v4616_v1, 0.0 }
 0x469   : > { %3619 = vst.msk [vmem:[%s5945_s12 + $0xe0] sm:$0xff] %vm3590_vm5, %v3586_v14  ;;  %v3587_v10 = vmax.f32 %v4618_v25, 0.0 }
 0x46a   : > { %3622 = vst.msk [vmem:[%s5945_s12 + $0xf8] sm:$0xff] %vm3590_vm5, %v3589_v59 }
 0x46b   : > { %3620 = vst.msk [vmem:[%s5945_s12 + $0xe8] sm:$0xff] %vm3590_vm5, %v3587_v10 }
 0x46c PF: > { %s19_s30 = sadd.s32 1, %s4934_s30  }
 0x46d   : > { %p16_p4 = scmp.ge.s32.totalorder %s19_s30, 4  }
 0x46f   :  { %18 = sbr.rel (!%p16_p4) target bundleno = 1 (0x1), region = 95 }

</bundles_post_ra>
